<compile_context>
chip_gen: v7x
topology: tpu7x:2x2x1
jax: 0.10.0
libtpu: 0.0.40
codegen_flags: <defaults>
</compile_context>

<pallas_src>
import functools

import jax
import jax.numpy as jnp
from jax import lax
from jax.experimental import pallas as pl
from jax.experimental.pallas import tpu as pltpu

BN_EPS = 1e-5
LANE = 128


def _round_up(x, m):
    return (x + m - 1) // m * m


def _vmem_limit_bytes():
    """Generation-aware scoped-VMEM limit: ~40 MiB on v7x (64 MiB physical),
    ~80 MiB on v5e/v6e (128 MiB physical)."""
    cap = 64 * 1024 * 1024
    try:
        info = pltpu.get_tpu_info()
        cap = int(getattr(info, "vmem_capacity_bytes", cap)) or cap
    except Exception:
        pass
    return min((cap * 5) // 8, 96 * 1024 * 1024)


_VMEM_LIMIT = _vmem_limit_bytes()


def _pick_tq(n_padded):
    for tq in (256, 128):
        if n_padded % tq == 0:
            return tq
    return n_padded  # n_padded is always a multiple of LANE


# ---------------------------------------------------------------------------
# Fused AttentionalPropagation kernel
#   grid = (stacked_batch, query_tiles); source selected via scalar prefetch.
# ---------------------------------------------------------------------------
def _attn_prop_kernel(sm_ref, nv_ref,
                      wq_ref, bq_ref, wkv_ref, bkv_ref, wm_ref, bm_ref,
                      w0x_ref, w0m_ref, b0_ref, w1_ref, b1_ref,
                      x_ref, src_ref, o_ref,
                      kv_ref, oh_ref, *, heads, head_dim):
    D = heads * head_dim
    t = pl.program_id(1)

    # K/V projection of the full source, computed once per batch element and
    # kept resident in a bf16 VMEM scratch across all query tiles.
    @pl.when(t == 0)
    def _():
        sb = src_ref[...].astype(jnp.bfloat16)
        kv = (jnp.dot(wkv_ref[...], sb, preferred_element_type=jnp.float32)
              + bkv_ref[...])
        kv_ref[...] = kv.astype(jnp.bfloat16)

    x = x_ref[...]                                        # (D, TQ) f32
    xb = x.astype(jnp.bfloat16)
    # Q projection (the 1/sqrt(head_dim) score scale is folded into wq/bq).
    q = jnp.dot(wq_ref[...], xb, preferred_element_type=jnp.float32) + bq_ref[...]
    qb = q.astype(jnp.bfloat16)                           # (D, TQ)

    nk = kv_ref.shape[-1]
    # Additive key-padding bias, (1, Nk), shared by all heads (no full mask).
    nv = nv_ref[0]
    kbias = jnp.where(lax.broadcasted_iota(jnp.int32, (1, nk), 1) < nv,
                      jnp.float32(0.0), jnp.float32(-1e30))
    ones_row = jnp.ones((1, nk), jnp.bfloat16)            # softmax denominators

    for h in range(heads):                  # heads are contiguous row blocks
        r0 = h * head_dim
        qh = qb[r0:r0 + head_dim, :]                      # (d, TQ) bf16
        kh = kv_ref[r0:r0 + head_dim, :]                  # (d, Nk) bf16
        vh = kv_ref[D + r0:D + r0 + head_dim, :]          # (d, Nk) bf16
        # scores: contract over head_dim directly (no q transpose materialized)
        s = lax.dot_general(qh, kh, (((0,), (0,)), ((), ())),
                            preferred_element_type=jnp.float32)       # (TQ, Nk)
        s = s + kbias
        m = jnp.max(s, axis=-1, keepdims=True)
        # TODO(synk): on v6e/v7x the exp could be evaluated in bf16 on the EUP;
        # kept f32 here so the same kernel is exact-enough on v5e too.
        p = jnp.exp(s - m).astype(jnp.bfloat16)           # unnormalized, <= 1
        # Flash-style: normalize AFTER the PV matmul.  Denominator via a tiny
        # ones-row MXU matmul -> (1, TQ), no (TQ,1)->(1,TQ) relayout needed.
        denom = lax.dot_general(ones_row, p, (((1,), (1,)), ((), ())),
                                preferred_element_type=jnp.float32)   # (1, TQ)
        oh = lax.dot_general(vh, p, (((1,), (1,)), ((), ())),
                             preferred_element_type=jnp.float32)      # (d, TQ)
        oh_ref[r0:r0 + head_dim, :] = oh * pl.reciprocal(denom, approx=True)

    ob = oh_ref[...].astype(jnp.bfloat16)                 # (D, TQ), head-major
    # merge (weight columns permuted at init to consume head-major layout)
    message = (jnp.dot(wm_ref[...], ob, preferred_element_type=jnp.float32)
               + bm_ref[...])
    # mlp0 with the concat folded into split weights, BN folded, ReLU fused
    mid = (jnp.dot(w0x_ref[...], xb, preferred_element_type=jnp.float32)
           + jnp.dot(w0m_ref[...], message.astype(jnp.bfloat16),
                     preferred_element_type=jnp.float32)
           + b0_ref[...])
    mid = jnp.maximum(mid, 0.0).astype(jnp.bfloat16)
    # mlp1 (scaling folded into weights/bias) + residual add
    delta = jnp.dot(w1_ref[...], mid, preferred_element_type=jnp.float32) + b1_ref[...]
    o_ref[...] = (x + delta).astype(o_ref.dtype)


def attentional_propagation(p, x, src_map, n_valid):
    """x: (G, D, Np) stacked descriptors.  Returns
    x + scaling * mlp(cat(x, attn(x, x[src_map], x[src_map])))."""
    G, D, Np = x.shape
    heads = p["heads"]
    head_dim = D // heads
    TQ = _pick_tq(Np)
    kernel = functools.partial(_attn_prop_kernel, heads=heads, head_dim=head_dim)
    wspec = lambda shape: pl.BlockSpec(shape, lambda g, t, sm, nv: (0, 0))
    return pl.pallas_call(
        kernel,
        out_shape=jax.ShapeDtypeStruct((G, D, Np), x.dtype),
        grid_spec=pltpu.PrefetchScalarGridSpec(
            num_scalar_prefetch=2,                 # (src_map, n_valid) in SMEM
            grid=(G, Np // TQ),
            in_specs=[
                wspec((D, D)), wspec((D, 1)),              # Wq*scale, bq*scale
                wspec((2 * D, D)), wspec((2 * D, 1)),      # Wkv, bkv
                wspec((D, D)), wspec((D, 1)),              # Wm (head-major), bm
                wspec((2 * D, D)), wspec((2 * D, D)), wspec((2 * D, 1)),  # W0x, W0m, b0
                wspec((D, 2 * D)), wspec((D, 1)),          # W1*scaling, b1*scaling
                pl.BlockSpec((None, D, TQ), lambda g, t, sm, nv: (g, 0, t)),      # queries
                pl.BlockSpec((None, D, Np), lambda g, t, sm, nv: (sm[g], 0, 0)),  # source
            ],
            out_specs=pl.BlockSpec((None, D, TQ), lambda g, t, sm, nv: (g, 0, t)),
            scratch_shapes=[pltpu.VMEM((2 * D, Np), jnp.bfloat16),   # resident K/V
                            pltpu.VMEM((D, TQ), jnp.float32)],       # head-major attn out
        ),
        compiler_params=pltpu.CompilerParams(
            dimension_semantics=("parallel", "arbitrary"),
            vmem_limit_bytes=_VMEM_LIMIT),
    )(src_map, n_valid,
      p["wq"], p["bq"], p["wkv"], p["bkv"], p["wm"], p["bm"],
      p["w0x"], p["w0m"], p["b0"], p["w1s"], p["b1s"], x, x)


# ---------------------------------------------------------------------------
# Fused LineLayer MLP kernel: relu(W0@m + b0) -> W1@. + b1   (BN folded)
# ---------------------------------------------------------------------------
def _line_mlp_kernel(w0_ref, b0_ref, w1_ref, b1_ref, m_ref, o_ref):
    mb = m_ref[...].astype(jnp.bfloat16)
    mid = jnp.dot(w0_ref[...], mb, preferred_element_type=jnp.float32) + b0_ref[...]
    mid = jnp.maximum(mid, 0.0).astype(jnp.bfloat16)
    out = jnp.dot(w1_ref[...], mid, preferred_element_type=jnp.float32) + b1_ref[...]
    o_ref[...] = out.astype(o_ref.dtype)


def line_mlp(p, message):
    G, C3, M = message.shape
    D2 = p["w0f"].shape[0]
    D = p["w1"].shape[0]
    wspec = lambda shape: pl.BlockSpec(shape, lambda b: (0, 0))
    return pl.pallas_call(
        _line_mlp_kernel,
        out_shape=jax.ShapeDtypeStruct((G, D, M), message.dtype),
        grid=(G,),
        in_specs=[wspec((D2, C3)), wspec((D2, 1)), wspec((D, D2)), wspec((D, 1)),
                  pl.BlockSpec((None, C3, M), lambda b: (b, 0, 0))],
        out_specs=pl.BlockSpec((None, D, M), lambda b: (b, 0, 0)),
        compiler_params=pltpu.CompilerParams(
            dimension_semantics=("parallel",),
            vmem_limit_bytes=_VMEM_LIMIT),
    )(p["w0f"], p["b0f"], p["w1"], p["b1"], message)


# ---------------------------------------------------------------------------
# Parameter init (deterministic synthetic "PyTorch-layout" params) + prep
# ---------------------------------------------------------------------------
def fold_bn(w, b, bn):
    """Fold eval-mode BatchNorm1d into the preceding 1x1 conv (exact)."""
    scale = bn["weight"] / jnp.sqrt(bn["running_var"] + BN_EPS)
    return w * scale[:, None], scale * (b - bn["running_mean"]) + bn["bias"]


def init_conv(key, cout, cin, zero_bias=False):
    k1, k2 = jax.random.split(key)
    w = 0.1 * jax.random.normal(k1, (cout, cin), jnp.float32)
    b = (jnp.zeros((cout,), jnp.float32) if zero_bias
         else 0.1 * jax.random.normal(k2, (cout,), jnp.float32))
    return w, b


def init_bn(key, c):
    k1, k2, k3, k4 = jax.random.split(key, 4)
    return dict(weight=1.0 + 0.1 * jax.random.normal(k1, (c,), jnp.float32),
                bias=0.1 * jax.random.normal(k2, (c,), jnp.float32),
                running_mean=0.1 * jax.random.normal(k3, (c,), jnp.float32),
                running_var=0.5 + jax.random.uniform(k4, (c,), jnp.float32))


def prep_gnn_layer(raw, D, heads):
    """One-time preprocessing: head permutation, K/V stacking, BN / scaling /
    concat / score-scale folding, bf16 weight casts.  Mathematically identical
    (up to bf16 rounding) to the PyTorch layer."""
    d = D // heads
    # PyTorch .view(b, dim, h, -1): channel c -> (d_idx, head) = (c // h, c % h).
    # Reorder output channels to head-major so heads are contiguous row blocks.
    perm = jnp.arange(D).reshape(d, heads).T.reshape(-1)   # new channel -> old
    wq, bq = raw["proj_q"]
    wk, bk = raw["proj_k"]
    wv, bv = raw["proj_v"]
    wm, bm = raw["merge"]
    wkv = jnp.concatenate([wk[perm], wv[perm]], axis=0)
    bkv = jnp.concatenate([bk[perm], bv[perm]], axis=0)
    wm_h = wm[:, perm]                      # merge consumes head-major attn out
    w0, b0 = fold_bn(*raw["mlp0"], raw["bn0"])
    w1, b1 = raw["mlp1"]
    s = raw["scaling"]
    qs = 1.0 / (d ** 0.5)                   # score scale folded into Q projection
    return dict(
        heads=heads,
        wq=(wq[perm] * qs).astype(jnp.bfloat16),
        bq=(bq[perm] * qs).reshape(D, 1).astype(jnp.float32),
        wkv=wkv.astype(jnp.bfloat16),
        bkv=bkv.reshape(2 * D, 1).astype(jnp.float32),
        wm=wm_h.astype(jnp.bfloat16),
        bm=bm.reshape(D, 1).astype(jnp.float32),
        w0x=w0[:, :D].astype(jnp.bfloat16),          # concat split column-wise
        w0m=w0[:, D:].astype(jnp.bfloat16),
        b0=b0.reshape(2 * D, 1).astype(jnp.float32),
        w1s=(w1 * s).astype(jnp.bfloat16),           # scaling folded
        b1s=(b1 * s).reshape(D, 1).astype(jnp.float32),
    )


def init_gnn_layer(key, D, heads):
    keys = jax.random.split(key, 7)
    raw = dict(
        scaling=1.0,
        proj_q=init_conv(keys[0], D, D),
        proj_k=init_conv(keys[1], D, D),
        proj_v=init_conv(keys[2], D, D),
        merge=init_conv(keys[3], D, D),
        mlp0=init_conv(keys[4], 2 * D, 2 * D),
        bn0=init_bn(keys[5], 2 * D),
        mlp1=init_conv(keys[6], D, 2 * D, zero_bias=True),  # bias init'd to 0
    )
    return prep_gnn_layer(raw, D, heads)


def init_line_layer(key, D):
    keys = jax.random.split(key, 3)
    mlp0 = init_conv(keys[0], 2 * D, 3 * D)
    bn0 = init_bn(keys[1], 2 * D)
    w1, b1 = init_conv(keys[2], D, 2 * D)
    w0f, b0f = fold_bn(*mlp0, bn0)
    return dict(w0f=w0f.astype(jnp.bfloat16),
                b0f=b0f.reshape(2 * D, 1).astype(jnp.float32),
                w1=w1.astype(jnp.bfloat16),
                b1=b1.reshape(D, 1).astype(jnp.float32))


def init_attentional_gnn(key, feature_dim, layer_types, num_heads=4,
                         num_line_iterations=1):
    keys = jax.random.split(key, len(layer_types) + max(1, len(layer_types) // 2))
    layers = [init_gnn_layer(keys[i], feature_dim, num_heads)
              for i in range(len(layer_types))]
    line_layers = [init_line_layer(keys[len(layer_types) + j], feature_dim)
                   for j in range(len(layer_types) // 2)]
    return dict(layer_types=tuple(layer_types), layers=layers,
                line_layers=line_layers,
                num_line_iterations=num_line_iterations)


# ---------------------------------------------------------------------------
# LineLayer helpers (stacked batch)
# ---------------------------------------------------------------------------
def line_endpoint_update(p, ldesc, line_enc, lines_junc_idx):
    G, D, _ = ldesc.shape
    M = lines_junc_idx.shape[1]
    # TODO(synk): endpoint gather is data-dependent indexing; kept in plain JAX
    # (a manual-DMA gather kernel would be needed to express it in Pallas).
    idx = jnp.broadcast_to(lines_junc_idx[:, None, :], (G, D, M))
    line_desc = jnp.take_along_axis(ldesc, idx, axis=2)            # (G, D, 2L)
    flipped = line_desc.reshape(G, D, -1, 2)[..., ::-1].reshape(G, D, M)
    message = jnp.concatenate([line_desc, flipped, line_enc], axis=1)  # (G,3D,2L)
    Mp = _round_up(max(M, 1), LANE)                                # lane-dense pad
    message = jnp.pad(message, ((0, 0), (0, 0), (0, Mp - M)))
    out = line_mlp(p, message)                                     # (G, D, Mp)
    return out[:, :, :M]


def _scatter_mean(lupdate, idx, n_total):
    """torch.scatter_reduce(dim=2, reduce='mean', include_self=False) into zeros,
    expressed as a one-hot matmul (MXU instead of serialized scatters)."""
    onehot = (idx[:, :, None] == jnp.arange(n_total)[None, None, :]
              ).astype(lupdate.dtype)                              # (G, 2L, N)
    ssum = jnp.einsum('bdm,bmn->bdn', lupdate, onehot)             # (G, D, N)
    cnt = jnp.sum(onehot, axis=1)[:, None, :]                      # (G, 1, N)
    return jnp.where(cnt > 0, ssum / jnp.maximum(cnt, 1.0), 0.0)


def line_layer(p, x, line_enc, lines_junc_idx):
    lupdate = line_endpoint_update(p, x, line_enc, lines_junc_idx)
    return x + _scatter_mean(lupdate, lines_junc_idx, x.shape[-1])


# ---------------------------------------------------------------------------
# Forward pass
# ---------------------------------------------------------------------------
def attentional_gnn_forward(params, desc0, desc1, line_enc0, line_enc1,
                            lines_junc_idx0, lines_junc_idx1):
    B, D, N = desc0.shape
    Np = _round_up(max(N, 1), LANE)
    # Stack both descriptor sets along the batch axis once; each GNN layer then
    # updates all of them in ONE pallas_call, with the attention source picked
    # per grid step by a scalar-prefetched index map (self: g, cross: swap).
    x = jnp.pad(jnp.concatenate([desc0, desc1], axis=0),
                ((0, 0), (0, 0), (0, Np - N)))                     # (2B, D, Np)
    G = 2 * B
    self_map = jnp.arange(G, dtype=jnp.int32)
    cross_map = jnp.concatenate([jnp.arange(B, 2 * B, dtype=jnp.int32),
                                 jnp.arange(0, B, dtype=jnp.int32)])
    n_valid = jnp.array([N], dtype=jnp.int32)
    line_enc = jnp.concatenate([line_enc0, line_enc1], axis=0)
    junc_idx = jnp.concatenate([lines_junc_idx0, lines_junc_idx1], axis=0)
    has_lines = (lines_junc_idx0.shape[1] > 0) and (lines_junc_idx1.shape[1] > 0)

    for i, ltype in enumerate(params["layer_types"]):
        src_map = cross_map if ltype == "cross" else self_map
        x = attentional_propagation(params["layers"][i], x, src_map, n_valid)
        if ltype == "self" and has_lines:
            for _ in range(params["num_line_iterations"]):
                x = line_layer(params["line_layers"][i // 2], x, line_enc, junc_idx)

    x = x[:, :, :N]
    return x[:B], x[B:]


# ---------------------------------------------------------------------------
# Demo
# ---------------------------------------------------------------------------
if __name__ == "__main__":
    key = jax.random.PRNGKey(0)
    B, D, N, heads, L = 2, 64, 16, 4, 4          # 2L = 8 line-endpoint entries
    layer_types = ["self", "cross"]

    k_params, k0, k1, k2, k3, k4, k5 = jax.random.split(key, 7)
    params = init_attentional_gnn(k_params, D, layer_types, num_heads=heads)

    desc0 = jax.random.normal(k0, (B, D, N), jnp.float32)
    desc1 = jax.random.normal(k1, (B, D, N), jnp.float32)
    line_enc0 = jax.random.normal(k2, (B, D, 2 * L), jnp.float32)
    line_enc1 = jax.random.normal(k3, (B, D, 2 * L), jnp.float32)
    lines_junc_idx0 = jax.random.randint(k4, (B, 2 * L), 0, N, dtype=jnp.int32)
    lines_junc_idx1 = jax.random.randint(k5, (B, 2 * L), 0, N, dtype=jnp.int32)

    out0, out1 = attentional_gnn_forward(params, desc0, desc1, line_enc0,
                                         line_enc1, lines_junc_idx0,
                                         lines_junc_idx1)
    jax.block_until_ready((out0, out1))
    assert out0.shape == (B, D, N) and out1.shape == (B, D, N)
    assert bool(jnp.all(jnp.isfinite(out0))) and bool(jnp.all(jnp.isfinite(out1)))
    print("KERNEL_OK")
</pallas_src>

<mosaic_0001>
module attributes {stable_mosaic.version = 11 : i64} {
  func.func @_attn_prop_kernel(%arg0: i32, %arg1: i32, %arg2: memref<4xi32, #tpu.memory_space<smem>>, %arg3: memref<1xi32, #tpu.memory_space<smem>>, %arg4: memref<64x64xbf16, #tpu.memory_space<vmem>>, %arg5: memref<64x1xf32, #tpu.memory_space<vmem>>, %arg6: memref<128x64xbf16, #tpu.memory_space<vmem>>, %arg7: memref<128x1xf32, #tpu.memory_space<vmem>>, %arg8: memref<64x64xbf16, #tpu.memory_space<vmem>>, %arg9: memref<64x1xf32, #tpu.memory_space<vmem>>, %arg10: memref<128x64xbf16, #tpu.memory_space<vmem>>, %arg11: memref<128x64xbf16, #tpu.memory_space<vmem>>, %arg12: memref<128x1xf32, #tpu.memory_space<vmem>>, %arg13: memref<64x128xbf16, #tpu.memory_space<vmem>>, %arg14: memref<64x1xf32, #tpu.memory_space<vmem>>, %arg15: memref<1x64x128xf32, #tpu.memory_space<vmem>>, %arg16: memref<1x64x128xf32, #tpu.memory_space<vmem>>, %arg17: memref<1x64x128xf32, #tpu.memory_space<vmem>>, %arg18: memref<128x128xbf16, #tpu.memory_space<vmem>>, %arg19: memref<64x128xf32, #tpu.memory_space<vmem>>) attributes {dimension_semantics = [#tpu.dimension_semantics<parallel>, #tpu.dimension_semantics<arbitrary>], iteration_bounds = array<i64: 4, 1>, scalar_prefetch = 2 : i64, scratch_operands = 2 : i64, tpu.core_type = #tpu.core_type<tc>, window_params = [{pipeline_mode = #tpu.pipeline_mode<synchronous>, transform_indices = @transform_0, window_bounds = array<i64: 64, 64>}, {pipeline_mode = #tpu.pipeline_mode<synchronous>, transform_indices = @transform_1, window_bounds = array<i64: 64, 1>}, {pipeline_mode = #tpu.pipeline_mode<synchronous>, transform_indices = @transform_2, window_bounds = array<i64: 128, 64>}, {pipeline_mode = #tpu.pipeline_mode<synchronous>, transform_indices = @transform_3, window_bounds = array<i64: 128, 1>}, {pipeline_mode = #tpu.pipeline_mode<synchronous>, transform_indices = @transform_4, window_bounds = array<i64: 64, 64>}, {pipeline_mode = #tpu.pipeline_mode<synchronous>, transform_indices = @transform_5, window_bounds = array<i64: 64, 1>}, {pipeline_mode = #tpu.pipeline_mode<synchronous>, transform_indices = @transform_6, window_bounds = array<i64: 128, 64>}, {pipeline_mode = #tpu.pipeline_mode<synchronous>, transform_indices = @transform_7, window_bounds = array<i64: 128, 64>}, {pipeline_mode = #tpu.pipeline_mode<synchronous>, transform_indices = @transform_8, window_bounds = array<i64: 128, 1>}, {pipeline_mode = #tpu.pipeline_mode<synchronous>, transform_indices = @transform_9, window_bounds = array<i64: 64, 128>}, {pipeline_mode = #tpu.pipeline_mode<synchronous>, transform_indices = @transform_10, window_bounds = array<i64: 64, 1>}, {transform_indices = @transform_11, window_bounds = array<i64: 1, 64, 128>}, {transform_indices = @transform_12, window_bounds = array<i64: 1, 64, 128>}, {transform_indices = @transform_13, window_bounds = array<i64: 1, 64, 128>}]} {
    %c0_i32 = arith.constant 0 : i32
    %0 = arith.cmpi eq, %arg1, %c0_i32 : i32
    %1 = arith.extui %0 : i1 to i32
    %c0_i32_0 = arith.constant 0 : i32
    %2 = arith.cmpi ne, %1, %c0_i32_0 : i32
    scf.if %2 {
      %c0_68 = arith.constant 0 : index
      %c0_69 = arith.constant 0 : index
      %c0_70 = arith.constant 0 : index
      %120 = vector.load %arg16[%c0_68, %c0_69, %c0_70] : memref<1x64x128xf32, #tpu.memory_space<vmem>>, vector<1x64x128xf32>
      %121 = vector.shape_cast %120 : vector<1x64x128xf32> to vector<64x128xf32>
      %122 = arith.truncf %121 : vector<64x128xf32> to vector<64x128xbf16>
      %c0_71 = arith.constant 0 : index
      %c0_72 = arith.constant 0 : index
      %123 = vector.load %arg6[%c0_71, %c0_72] : memref<128x64xbf16, #tpu.memory_space<vmem>>, vector<128x64xbf16>
      %cst_73 = arith.constant dense<0.000000e+00> : vector<128x128xf32>
      %124 = tpu.matmul %123, %122, %cst_73 {dimension_numbers = #tpu.dot_dimension_numbers<[1], [0], [0], [1], [0, 0, 1, 1], [], []>} : vector<128x64xbf16>, vector<64x128xbf16>, vector<128x128xf32> -> vector<128x128xf32>
      %c0_74 = arith.constant 0 : index
      %c0_75 = arith.constant 0 : index
      %125 = vector.load %arg7[%c0_74, %c0_75] : memref<128x1xf32, #tpu.memory_space<vmem>>, vector<128x1xf32>
      %126 = vector.broadcast %125 : vector<128x1xf32> to vector<128x128xf32>
      %127 = arith.addf %124, %126 : vector<128x128xf32>
      %128 = arith.truncf %127 : vector<128x128xf32> to vector<128x128xbf16>
      %c0_76 = arith.constant 0 : index
      %c0_77 = arith.constant 0 : index
      %129 = vector.load %arg18[%c0_76, %c0_77] : memref<128x128xbf16, #tpu.memory_space<vmem>>, vector<128x128xbf16>
      tpu.vector_store %arg18[%c0_76, %c0_77], %128 {strides = array<i32>} : memref<128x128xbf16, #tpu.memory_space<vmem>>, vector<128x128xbf16>,
    } else {
    }
    %c0 = arith.constant 0 : index
    %c0_1 = arith.constant 0 : index
    %c0_2 = arith.constant 0 : index
    %3 = vector.load %arg15[%c0, %c0_1, %c0_2] : memref<1x64x128xf32, #tpu.memory_space<vmem>>, vector<1x64x128xf32>
    %4 = vector.shape_cast %3 : vector<1x64x128xf32> to vector<64x128xf32>
    %5 = arith.truncf %4 : vector<64x128xf32> to vector<64x128xbf16>
    %c0_3 = arith.constant 0 : index
    %c0_4 = arith.constant 0 : index
    %6 = vector.load %arg4[%c0_3, %c0_4] : memref<64x64xbf16, #tpu.memory_space<vmem>>, vector<64x64xbf16>
    %cst = arith.constant dense<0.000000e+00> : vector<64x128xf32>
    %7 = tpu.matmul %6, %5, %cst {dimension_numbers = #tpu.dot_dimension_numbers<[1], [0], [0], [1], [0, 0, 1, 1], [], []>} : vector<64x64xbf16>, vector<64x128xbf16>, vector<64x128xf32> -> vector<64x128xf32>
    %c0_5 = arith.constant 0 : index
    %c0_6 = arith.constant 0 : index
    %8 = vector.load %arg5[%c0_5, %c0_6] : memref<64x1xf32, #tpu.memory_space<vmem>>, vector<64x1xf32>
    %9 = vector.broadcast %8 : vector<64x1xf32> to vector<64x128xf32>
    %10 = arith.addf %7, %9 : vector<64x128xf32>
    %11 = arith.truncf %10 : vector<64x128xf32> to vector<64x128xbf16>
    %c0_7 = arith.constant 0 : index
    %12 = memref.load %arg3[%c0_7] : memref<1xi32, #tpu.memory_space<smem>>
    %13 = tpu.iota {dimensions = array<i32: 1>} : vector<1x128xi32>
    %14 = vector.broadcast %12 : i32 to vector<1x128xi32>
    %15 = arith.cmpi slt, %13, %14 : vector<1x128xi32>
    %cst_8 = arith.constant 0.000000e+00 : f32
    %cst_9 = arith.constant -1.000000e+30 : f32
    %16 = vector.broadcast %cst_8 : f32 to vector<1x128xf32>
    %17 = vector.broadcast %cst_9 : f32 to vector<1x128xf32>
    %18 = arith.select %15, %16, %17 : vector<1x128xi1>, vector<1x128xf32>
    %cst_10 = arith.constant 1.000000e+00 : bf16
    %19 = vector.broadcast %cst_10 : bf16 to vector<1x128xbf16>
    %20 = vector.extract_strided_slice %11 {offsets = [0, 0], sizes = [16, 128], strides = [1, 1]} : vector<64x128xbf16> to vector<16x128xbf16>
    %c0_11 = arith.constant 0 : index
    %c0_12 = arith.constant 0 : index
    %21 = vector.load %arg18[%c0_11, %c0_12] : memref<128x128xbf16, #tpu.memory_space<vmem>>, vector<16x128xbf16>
    %c64 = arith.constant 64 : index
    %c0_13 = arith.constant 0 : index
    %22 = vector.load %arg18[%c64, %c0_13] : memref<128x128xbf16, #tpu.memory_space<vmem>>, vector<16x128xbf16>
    %cst_14 = arith.constant dense<0.000000e+00> : vector<128x128xf32>
    %23 = tpu.matmul %20, %21, %cst_14 {dimension_numbers = #tpu.dot_dimension_numbers<[0], [0], [1], [1], [0, 1, 1, 1], [], []>} : vector<16x128xbf16>, vector<16x128xbf16>, vector<128x128xf32> -> vector<128x128xf32>
    %24 = vector.broadcast %18 : vector<1x128xf32> to vector<128x128xf32>
    %25 = arith.addf %23, %24 : vector<128x128xf32>
    %cst_15 = arith.constant dense<0xFF800000> : vector<128xf32>
    %26 = vector.multi_reduction <maximumf>, %25, %cst_15 [1] : vector<128x128xf32> to vector<128xf32>
    %27 = vector.shape_cast %26 : vector<128xf32> to vector<128x1xf32>
    %28 = vector.broadcast %27 : vector<128x1xf32> to vector<128x128xf32>
    %29 = arith.subf %25, %28 : vector<128x128xf32>
    %30 = math.exp %29 : vector<128x128xf32>
    %31 = arith.truncf %30 : vector<128x128xf32> to vector<128x128xbf16>
    %cst_16 = arith.constant dense<0.000000e+00> : vector<1x128xf32>
    %32 = tpu.matmul %19, %31, %cst_16 {dimension_numbers = #tpu.dot_dimension_numbers<[1], [1], [0], [0], [0, 0, 1, 0], [], []>} : vector<1x128xbf16>, vector<128x128xbf16>, vector<1x128xf32> -> vector<1x128xf32>
    %cst_17 = arith.constant dense<0.000000e+00> : vector<16x128xf32>
    %33 = tpu.matmul %22, %31, %cst_17 {dimension_numbers = #tpu.dot_dimension_numbers<[1], [1], [0], [0], [0, 0, 1, 0], [], []>} : vector<16x128xbf16>, vector<128x128xbf16>, vector<16x128xf32> -> vector<16x128xf32>
    %34 = tpu.reciprocal %32 {approx = true} : vector<1x128xf32> -> vector<1x128xf32>
    %35 = vector.broadcast %34 : vector<1x128xf32> to vector<16x128xf32>
    %36 = arith.mulf %33, %35 : vector<16x128xf32>
    %c0_18 = arith.constant 0 : index
    %c0_19 = arith.constant 0 : index
    %37 = vector.load %arg19[%c0_18, %c0_19] : memref<64x128xf32, #tpu.memory_space<vmem>>, vector<16x128xf32>
    tpu.vector_store %arg19[%c0_18, %c0_19], %36 {strides = array<i32>} : memref<64x128xf32, #tpu.memory_space<vmem>>, vector<16x128xf32>,
    %38 = vector.extract_strided_slice %11 {offsets = [16, 0], sizes = [16, 128], strides = [1, 1]} : vector<64x128xbf16> to vector<16x128xbf16>
    %c16 = arith.constant 16 : index
    %c0_20 = arith.constant 0 : index
    %39 = vector.load %arg18[%c16, %c0_20] : memref<128x128xbf16, #tpu.memory_space<vmem>>, vector<16x128xbf16>
    %c80 = arith.constant 80 : index
    %c0_21 = arith.constant 0 : index
    %40 = vector.load %arg18[%c80, %c0_21] : memref<128x128xbf16, #tpu.memory_space<vmem>>, vector<16x128xbf16>
    %cst_22 = arith.constant dense<0.000000e+00> : vector<128x128xf32>
    %41 = tpu.matmul %38, %39, %cst_22 {dimension_numbers = #tpu.dot_dimension_numbers<[0], [0], [1], [1], [0, 1, 1, 1], [], []>} : vector<16x128xbf16>, vector<16x128xbf16>, vector<128x128xf32> -> vector<128x128xf32>
    %42 = vector.broadcast %18 : vector<1x128xf32> to vector<128x128xf32>
    %43 = arith.addf %41, %42 : vector<128x128xf32>
    %cst_23 = arith.constant dense<0xFF800000> : vector<128xf32>
    %44 = vector.multi_reduction <maximumf>, %43, %cst_23 [1] : vector<128x128xf32> to vector<128xf32>
    %45 = vector.shape_cast %44 : vector<128xf32> to vector<128x1xf32>
    %46 = vector.broadcast %45 : vector<128x1xf32> to vector<128x128xf32>
    %47 = arith.subf %43, %46 : vector<128x128xf32>
    %48 = math.exp %47 : vector<128x128xf32>
    %49 = arith.truncf %48 : vector<128x128xf32> to vector<128x128xbf16>
    %cst_24 = arith.constant dense<0.000000e+00> : vector<1x128xf32>
    %50 = tpu.matmul %19, %49, %cst_24 {dimension_numbers = #tpu.dot_dimension_numbers<[1], [1], [0], [0], [0, 0, 1, 0], [], []>} : vector<1x128xbf16>, vector<128x128xbf16>, vector<1x128xf32> -> vector<1x128xf32>
    %cst_25 = arith.constant dense<0.000000e+00> : vector<16x128xf32>
    %51 = tpu.matmul %40, %49, %cst_25 {dimension_numbers = #tpu.dot_dimension_numbers<[1], [1], [0], [0], [0, 0, 1, 0], [], []>} : vector<16x128xbf16>, vector<128x128xbf16>, vector<16x128xf32> -> vector<16x128xf32>
    %52 = tpu.reciprocal %50 {approx = true} : vector<1x128xf32> -> vector<1x128xf32>
    %53 = vector.broadcast %52 : vector<1x128xf32> to vector<16x128xf32>
    %54 = arith.mulf %51, %53 : vector<16x128xf32>
    %c16_26 = arith.constant 16 : index
    %c0_27 = arith.constant 0 : index
    %55 = vector.load %arg19[%c16_26, %c0_27] : memref<64x128xf32, #tpu.memory_space<vmem>>, vector<16x128xf32>
    tpu.vector_store %arg19[%c16_26, %c0_27], %54 {strides = array<i32>} : memref<64x128xf32, #tpu.memory_space<vmem>>, vector<16x128xf32>,
    %56 = vector.extract_strided_slice %11 {offsets = [32, 0], sizes = [16, 128], strides = [1, 1]} : vector<64x128xbf16> to vector<16x128xbf16>
    %c32 = arith.constant 32 : index
    %c0_28 = arith.constant 0 : index
    %57 = vector.load %arg18[%c32, %c0_28] : memref<128x128xbf16, #tpu.memory_space<vmem>>, vector<16x128xbf16>
    %c96 = arith.constant 96 : index
    %c0_29 = arith.constant 0 : index
    %58 = vector.load %arg18[%c96, %c0_29] : memref<128x128xbf16, #tpu.memory_space<vmem>>, vector<16x128xbf16>
    %cst_30 = arith.constant dense<0.000000e+00> : vector<128x128xf32>
    %59 = tpu.matmul %56, %57, %cst_30 {dimension_numbers = #tpu.dot_dimension_numbers<[0], [0], [1], [1], [0, 1, 1, 1], [], []>} : vector<16x128xbf16>, vector<16x128xbf16>, vector<128x128xf32> -> vector<128x128xf32>
    %60 = vector.broadcast %18 : vector<1x128xf32> to vector<128x128xf32>
    %61 = arith.addf %59, %60 : vector<128x128xf32>
    %cst_31 = arith.constant dense<0xFF800000> : vector<128xf32>
    %62 = vector.multi_reduction <maximumf>, %61, %cst_31 [1] : vector<128x128xf32> to vector<128xf32>
    %63 = vector.shape_cast %62 : vector<128xf32> to vector<128x1xf32>
    %64 = vector.broadcast %63 : vector<128x1xf32> to vector<128x128xf32>
    %65 = arith.subf %61, %64 : vector<128x128xf32>
    %66 = math.exp %65 : vector<128x128xf32>
    %67 = arith.truncf %66 : vector<128x128xf32> to vector<128x128xbf16>
    %cst_32 = arith.constant dense<0.000000e+00> : vector<1x128xf32>
    %68 = tpu.matmul %19, %67, %cst_32 {dimension_numbers = #tpu.dot_dimension_numbers<[1], [1], [0], [0], [0, 0, 1, 0], [], []>} : vector<1x128xbf16>, vector<128x128xbf16>, vector<1x128xf32> -> vector<1x128xf32>
    %cst_33 = arith.constant dense<0.000000e+00> : vector<16x128xf32>
    %69 = tpu.matmul %58, %67, %cst_33 {dimension_numbers = #tpu.dot_dimension_numbers<[1], [1], [0], [0], [0, 0, 1, 0], [], []>} : vector<16x128xbf16>, vector<128x128xbf16>, vector<16x128xf32> -> vector<16x128xf32>
    %70 = tpu.reciprocal %68 {approx = true} : vector<1x128xf32> -> vector<1x128xf32>
    %71 = vector.broadcast %70 : vector<1x128xf32> to vector<16x128xf32>
    %72 = arith.mulf %69, %71 : vector<16x128xf32>
    %c32_34 = arith.constant 32 : index
    %c0_35 = arith.constant 0 : index
    %73 = vector.load %arg19[%c32_34, %c0_35] : memref<64x128xf32, #tpu.memory_space<vmem>>, vector<16x128xf32>
    tpu.vector_store %arg19[%c32_34, %c0_35], %72 {strides = array<i32>} : memref<64x128xf32, #tpu.memory_space<vmem>>, vector<16x128xf32>,
    %74 = vector.extract_strided_slice %11 {offsets = [48, 0], sizes = [16, 128], strides = [1, 1]} : vector<64x128xbf16> to vector<16x128xbf16>
    %c48 = arith.constant 48 : index
    %c0_36 = arith.constant 0 : index
    %75 = vector.load %arg18[%c48, %c0_36] : memref<128x128xbf16, #tpu.memory_space<vmem>>, vector<16x128xbf16>
    %c112 = arith.constant 112 : index
    %c0_37 = arith.constant 0 : index
    %76 = vector.load %arg18[%c112, %c0_37] : memref<128x128xbf16, #tpu.memory_space<vmem>>, vector<16x128xbf16>
    %cst_38 = arith.constant dense<0.000000e+00> : vector<128x128xf32>
    %77 = tpu.matmul %74, %75, %cst_38 {dimension_numbers = #tpu.dot_dimension_numbers<[0], [0], [1], [1], [0, 1, 1, 1], [], []>} : vector<16x128xbf16>, vector<16x128xbf16>, vector<128x128xf32> -> vector<128x128xf32>
    %78 = vector.broadcast %18 : vector<1x128xf32> to vector<128x128xf32>
    %79 = arith.addf %77, %78 : vector<128x128xf32>
    %cst_39 = arith.constant dense<0xFF800000> : vector<128xf32>
    %80 = vector.multi_reduction <maximumf>, %79, %cst_39 [1] : vector<128x128xf32> to vector<128xf32>
    %81 = vector.shape_cast %80 : vector<128xf32> to vector<128x1xf32>
    %82 = vector.broadcast %81 : vector<128x1xf32> to vector<128x128xf32>
    %83 = arith.subf %79, %82 : vector<128x128xf32>
    %84 = math.exp %83 : vector<128x128xf32>
    %85 = arith.truncf %84 : vector<128x128xf32> to vector<128x128xbf16>
    %cst_40 = arith.constant dense<0.000000e+00> : vector<1x128xf32>
    %86 = tpu.matmul %19, %85, %cst_40 {dimension_numbers = #tpu.dot_dimension_numbers<[1], [1], [0], [0], [0, 0, 1, 0], [], []>} : vector<1x128xbf16>, vector<128x128xbf16>, vector<1x128xf32> -> vector<1x128xf32>
    %cst_41 = arith.constant dense<0.000000e+00> : vector<16x128xf32>
    %87 = tpu.matmul %76, %85, %cst_41 {dimension_numbers = #tpu.dot_dimension_numbers<[1], [1], [0], [0], [0, 0, 1, 0], [], []>} : vector<16x128xbf16>, vector<128x128xbf16>, vector<16x128xf32> -> vector<16x128xf32>
    %88 = tpu.reciprocal %86 {approx = true} : vector<1x128xf32> -> vector<1x128xf32>
    %89 = vector.broadcast %88 : vector<1x128xf32> to vector<16x128xf32>
    %90 = arith.mulf %87, %89 : vector<16x128xf32>
    %c48_42 = arith.constant 48 : index
    %c0_43 = arith.constant 0 : index
    %91 = vector.load %arg19[%c48_42, %c0_43] : memref<64x128xf32, #tpu.memory_space<vmem>>, vector<16x128xf32>
    tpu.vector_store %arg19[%c48_42, %c0_43], %90 {strides = array<i32>} : memref<64x128xf32, #tpu.memory_space<vmem>>, vector<16x128xf32>,
    %c0_44 = arith.constant 0 : index
    %c0_45 = arith.constant 0 : index
    %92 = vector.load %arg19[%c0_44, %c0_45] : memref<64x128xf32, #tpu.memory_space<vmem>>, vector<64x128xf32>
    %93 = arith.truncf %92 : vector<64x128xf32> to vector<64x128xbf16>
    %c0_46 = arith.constant 0 : index
    %c0_47 = arith.constant 0 : index
    %94 = vector.load %arg8[%c0_46, %c0_47] : memref<64x64xbf16, #tpu.memory_space<vmem>>, vector<64x64xbf16>
    %cst_48 = arith.constant dense<0.000000e+00> : vector<64x128xf32>
    %95 = tpu.matmul %94, %93, %cst_48 {dimension_numbers = #tpu.dot_dimension_numbers<[1], [0], [0], [1], [0, 0, 1, 1], [], []>} : vector<64x64xbf16>, vector<64x128xbf16>, vector<64x128xf32> -> vector<64x128xf32>
    %c0_49 = arith.constant 0 : index
    %c0_50 = arith.constant 0 : index
    %96 = vector.load %arg9[%c0_49, %c0_50] : memref<64x1xf32, #tpu.memory_space<vmem>>, vector<64x1xf32>
    %97 = vector.broadcast %96 : vector<64x1xf32> to vector<64x128xf32>
    %98 = arith.addf %95, %97 : vector<64x128xf32>
    %c0_51 = arith.constant 0 : index
    %c0_52 = arith.constant 0 : index
    %99 = vector.load %arg10[%c0_51, %c0_52] : memref<128x64xbf16, #tpu.memory_space<vmem>>, vector<128x64xbf16>
    %cst_53 = arith.constant dense<0.000000e+00> : vector<128x128xf32>
    %100 = tpu.matmul %99, %5, %cst_53 {dimension_numbers = #tpu.dot_dimension_numbers<[1], [0], [0], [1], [0, 0, 1, 1], [], []>} : vector<128x64xbf16>, vector<64x128xbf16>, vector<128x128xf32> -> vector<128x128xf32>
    %c0_54 = arith.constant 0 : index
    %c0_55 = arith.constant 0 : index
    %101 = vector.load %arg11[%c0_54, %c0_55] : memref<128x64xbf16, #tpu.memory_space<vmem>>, vector<128x64xbf16>
    %102 = arith.truncf %98 : vector<64x128xf32> to vector<64x128xbf16>
    %cst_56 = arith.constant dense<0.000000e+00> : vector<128x128xf32>
    %103 = tpu.matmul %101, %102, %cst_56 {dimension_numbers = #tpu.dot_dimension_numbers<[1], [0], [0], [1], [0, 0, 1, 1], [], []>} : vector<128x64xbf16>, vector<64x128xbf16>, vector<128x128xf32> -> vector<128x128xf32>
    %104 = arith.addf %100, %103 : vector<128x128xf32>
    %c0_57 = arith.constant 0 : index
    %c0_58 = arith.constant 0 : index
    %105 = vector.load %arg12[%c0_57, %c0_58] : memref<128x1xf32, #tpu.memory_space<vmem>>, vector<128x1xf32>
    %106 = vector.broadcast %105 : vector<128x1xf32> to vector<128x128xf32>
    %107 = arith.addf %104, %106 : vector<128x128xf32>
    %cst_59 = arith.constant 0.000000e+00 : f32
    %108 = vector.broadcast %cst_59 : f32 to vector<128x128xf32>
    %109 = arith.maximumf %107, %108 : vector<128x128xf32>
    %110 = arith.truncf %109 : vector<128x128xf32> to vector<128x128xbf16>
    %c0_60 = arith.constant 0 : index
    %c0_61 = arith.constant 0 : index
    %111 = vector.load %arg13[%c0_60, %c0_61] : memref<64x128xbf16, #tpu.memory_space<vmem>>, vector<64x128xbf16>
    %cst_62 = arith.constant dense<0.000000e+00> : vector<64x128xf32>
    %112 = tpu.matmul %111, %110, %cst_62 {dimension_numbers = #tpu.dot_dimension_numbers<[1], [0], [0], [1], [0, 0, 1, 1], [], []>} : vector<64x128xbf16>, vector<128x128xbf16>, vector<64x128xf32> -> vector<64x128xf32>
    %c0_63 = arith.constant 0 : index
    %c0_64 = arith.constant 0 : index
    %113 = vector.load %arg14[%c0_63, %c0_64] : memref<64x1xf32, #tpu.memory_space<vmem>>, vector<64x1xf32>
    %114 = vector.broadcast %113 : vector<64x1xf32> to vector<64x128xf32>
    %115 = arith.addf %112, %114 : vector<64x128xf32>
    %116 = arith.addf %4, %115 : vector<64x128xf32>
    %c0_65 = arith.constant 0 : index
    %c0_66 = arith.constant 0 : index
    %c0_67 = arith.constant 0 : index
    %117 = vector.load %arg17[%c0_65, %c0_66, %c0_67] : memref<1x64x128xf32, #tpu.memory_space<vmem>>, vector<1x64x128xf32>
    %118 = vector.shape_cast %117 : vector<1x64x128xf32> to vector<64x128xf32>
    %119 = vector.shape_cast %116 : vector<64x128xf32> to vector<1x64x128xf32>
    tpu.vector_store %arg17[%c0_65, %c0_66, %c0_67], %119 {strides = array<i32>} : memref<1x64x128xf32, #tpu.memory_space<vmem>>, vector<1x64x128xf32>,
    return
  }
  func.func @transform_0(%arg0: i32, %arg1: i32, %arg2: memref<4xi32, #tpu.memory_space<smem>>, %arg3: memref<1xi32, #tpu.memory_space<smem>>) -> (i32, i32) {
    %c0_i32 = arith.constant 0 : i32
    %c0_i32_0 = arith.constant 0 : i32
    %c0_i32_1 = arith.constant 0 : i32
    return %c0_i32, %c0_i32_0 : i32, i32
  }
  func.func @transform_1(%arg0: i32, %arg1: i32, %arg2: memref<4xi32, #tpu.memory_space<smem>>, %arg3: memref<1xi32, #tpu.memory_space<smem>>) -> (i32, i32) {
    %c0_i32 = arith.constant 0 : i32
    %c0_i32_0 = arith.constant 0 : i32
    %c0_i32_1 = arith.constant 0 : i32
    return %c0_i32, %c0_i32_0 : i32, i32
  }
  func.func @transform_2(%arg0: i32, %arg1: i32, %arg2: memref<4xi32, #tpu.memory_space<smem>>, %arg3: memref<1xi32, #tpu.memory_space<smem>>) -> (i32, i32) {
    %c0_i32 = arith.constant 0 : i32
    %c0_i32_0 = arith.constant 0 : i32
    %c0_i32_1 = arith.constant 0 : i32
    return %c0_i32, %c0_i32_0 : i32, i32
  }
  func.func @transform_3(%arg0: i32, %arg1: i32, %arg2: memref<4xi32, #tpu.memory_space<smem>>, %arg3: memref<1xi32, #tpu.memory_space<smem>>) -> (i32, i32) {
    %c0_i32 = arith.constant 0 : i32
    %c0_i32_0 = arith.constant 0 : i32
    %c0_i32_1 = arith.constant 0 : i32
    return %c0_i32, %c0_i32_0 : i32, i32
  }
  func.func @transform_4(%arg0: i32, %arg1: i32, %arg2: memref<4xi32, #tpu.memory_space<smem>>, %arg3: memref<1xi32, #tpu.memory_space<smem>>) -> (i32, i32) {
    %c0_i32 = arith.constant 0 : i32
    %c0_i32_0 = arith.constant 0 : i32
    %c0_i32_1 = arith.constant 0 : i32
    return %c0_i32, %c0_i32_0 : i32, i32
  }
  func.func @transform_5(%arg0: i32, %arg1: i32, %arg2: memref<4xi32, #tpu.memory_space<smem>>, %arg3: memref<1xi32, #tpu.memory_space<smem>>) -> (i32, i32) {
    %c0_i32 = arith.constant 0 : i32
    %c0_i32_0 = arith.constant 0 : i32
    %c0_i32_1 = arith.constant 0 : i32
    return %c0_i32, %c0_i32_0 : i32, i32
  }
  func.func @transform_6(%arg0: i32, %arg1: i32, %arg2: memref<4xi32, #tpu.memory_space<smem>>, %arg3: memref<1xi32, #tpu.memory_space<smem>>) -> (i32, i32) {
    %c0_i32 = arith.constant 0 : i32
    %c0_i32_0 = arith.constant 0 : i32
    %c0_i32_1 = arith.constant 0 : i32
    return %c0_i32, %c0_i32_0 : i32, i32
  }
  func.func @transform_7(%arg0: i32, %arg1: i32, %arg2: memref<4xi32, #tpu.memory_space<smem>>, %arg3: memref<1xi32, #tpu.memory_space<smem>>) -> (i32, i32) {
    %c0_i32 = arith.constant 0 : i32
    %c0_i32_0 = arith.constant 0 : i32
    %c0_i32_1 = arith.constant 0 : i32
    return %c0_i32, %c0_i32_0 : i32, i32
  }
  func.func @transform_8(%arg0: i32, %arg1: i32, %arg2: memref<4xi32, #tpu.memory_space<smem>>, %arg3: memref<1xi32, #tpu.memory_space<smem>>) -> (i32, i32) {
    %c0_i32 = arith.constant 0 : i32
    %c0_i32_0 = arith.constant 0 : i32
    %c0_i32_1 = arith.constant 0 : i32
    return %c0_i32, %c0_i32_0 : i32, i32
  }
  func.func @transform_9(%arg0: i32, %arg1: i32, %arg2: memref<4xi32, #tpu.memory_space<smem>>, %arg3: memref<1xi32, #tpu.memory_space<smem>>) -> (i32, i32) {
    %c0_i32 = arith.constant 0 : i32
    %c0_i32_0 = arith.constant 0 : i32
    %c0_i32_1 = arith.constant 0 : i32
    return %c0_i32, %c0_i32_0 : i32, i32
  }
  func.func @transform_10(%arg0: i32, %arg1: i32, %arg2: memref<4xi32, #tpu.memory_space<smem>>, %arg3: memref<1xi32, #tpu.memory_space<smem>>) -> (i32, i32) {
    %c0_i32 = arith.constant 0 : i32
    %c0_i32_0 = arith.constant 0 : i32
    %c0_i32_1 = arith.constant 0 : i32
    return %c0_i32, %c0_i32_0 : i32, i32
  }
  func.func @transform_11(%arg0: i32, %arg1: i32, %arg2: memref<4xi32, #tpu.memory_space<smem>>, %arg3: memref<1xi32, #tpu.memory_space<smem>>) -> (i32, i32, i32) {
    %c0_i32 = arith.constant 0 : i32
    %c0_i32_0 = arith.constant 0 : i32
    return %arg0, %c0_i32, %arg1 : i32, i32, i32
  }
  func.func @transform_12(%arg0: i32, %arg1: i32, %arg2: memref<4xi32, #tpu.memory_space<smem>>, %arg3: memref<1xi32, #tpu.memory_space<smem>>) -> (i32, i32, i32) {
    %0 = arith.index_cast %arg0 : i32 to index
    %1 = memref.load %arg2[%0] : memref<4xi32, #tpu.memory_space<smem>>
    %c0_i32 = arith.constant 0 : i32
    %c0_i32_0 = arith.constant 0 : i32
    %c0_i32_1 = arith.constant 0 : i32
    return %1, %c0_i32, %c0_i32_0 : i32, i32, i32
  }
  func.func @transform_13(%arg0: i32, %arg1: i32, %arg2: memref<4xi32, #tpu.memory_space<smem>>, %arg3: memref<1xi32, #tpu.memory_space<smem>>) -> (i32, i32, i32) {
    %c0_i32 = arith.constant 0 : i32
    %c0_i32_0 = arith.constant 0 : i32
    return %arg0, %c0_i32, %arg1 : i32, i32, i32
  }
}

</mosaic_0001>

<bundles_post_ra>
// kernel: tpu_custom_call.1
= control target key start
LH: loop header
LB: loop body
LE: loop exit
PB: predicated region body
PF: predicated region fallthrough
CT: control target
= control target key end

     0   :  { %s5266_s0 = inlined_call_operand.vmem [shape: s32[4], index: 0, kind: input, shape index: {}]   ;;  %s5267_s1 = inlined_call_operand.<no memory space> [shape: s32[1], index: 1, kind: input, shape index: {}]   ;;  %s5268_s2 = inlined_call_operand.vmem [shape: bf16[64,64], index: 2, kind: input, shape index: {}]   ;;  %s5269_s3 = inlined_call_operand.vmem [shape: f32[64,1], index: 3, kind: input, shape index: {}]   ;;  %s5270_s4 = inlined_call_operand.vmem [shape: bf16[128,64], index: 4, kind: input, shape index: {}]   ;;  %s5271_s5 = inlined_call_operand.vmem [shape: f32[128,1], index: 5, kind: input, shape index: {}]   ;;  %s5272_s6 = inlined_call_operand.vmem [shape: bf16[64,64], index: 6, kind: input, shape index: {}]   ;;  %s5273_s7 = inlined_call_operand.vmem [shape: f32[64,1], index: 7, kind: input, shape index: {}]   ;;  %s5274_s8 = inlined_call_operand.vmem [shape: bf16[128,64], index: 8, kind: input, shape index: {}]   ;;  %s5275_s9 = inlined_call_operand.vmem [shape: bf16[128,64], index: 9, kind: input, shape index: {}]   ;;  %s5276_s10 = inlined_call_operand.vmem [shape: f32[128,1], index: 10, kind: input, shape index: {}]   ;;  %s5277_s11 = inlined_call_operand.vmem [shape: bf16[64,128], index: 11, kind: input, shape index: {}]   ;;  %s5278_s12 = inlined_call_operand.vmem [shape: f32[64,1], index: 12, kind: input, shape index: {}]   ;;  %s5279_s13 = inlined_call_operand.vmem [shape: f32[4,64,128], index: 13, kind: input, shape index: {}]   ;;  %s5280_s14 = inlined_call_operand.vmem [shape: f32[4,64,128], index: 14, kind: input, shape index: {}]   ;;  %s5281_s15 = inlined_call_operand.hbm [shape: f32[4,64,128], index: 15, kind: output, shape index: {}]  }
   0x1   :  { %s20_s20 = sshll.u32 %s5266_s0, 4  ;;  %24 = sst [smem:[#allocation6]] %s5267_s1  ;;  %s21_s20 = int_to_ptr.vmem [resolvable:$true] %s20_s20 }
   0x2   :  { %s4089_s23 = scalar_lea.vmem %s21_s20, 16  ;;  %p4094_p1 = scmp.lt.s32.totalorder %s21_s20, %s21_s20 }
   0x3   :  { %p4090_p0 = scmp.ne.s32.totalorder %s21_s20, %s4089_s23  ;;  %p4095_p2 = scmp.lt.s32.totalorder %s4089_s23, %s4089_s23 }
   0x5   :  { %p4096_p3 = por %p4095_p2, %p4094_p1 }
   0x7   :  { %p4097_p4 = pnand %p4096_p3, %p4090_p0 }
   0x9   :  { %4100 = shalt.err (!%p4097_p4)  }
   0xa   :  { %s4183_s24 = smov [#allocation5]  }
   0xb   :  { %23 = dma.vmem_to_smem %s21_s20, 16, %s4183_s24, [#allocation4] }
   0xc   :  { %4153 = dma.done.wait [#allocation4], 16 }
   0xd   :  { %4154 = vsyncadd [#allocation4], 4294967280 }
   0xe   :  { %26 = sfence }
   0xf   :  { %27 = vsyncpa [#allocation8], 0 }
  0x10   :  { %29 = vsyncpa [#allocation8 + $0x1], 0  ;;  %s4278_s0 = smov 0   ;;  %s4280_s25 = smov 0  }
  0x11   :  { %s4282_s1 = smov 0   ;;  %s4284_s26 = smov 0  }
  0x12   :  { %s4286_s27 = smov 0   ;;  %s4288_s28 = smov 0  }
  0x13 LB: > { %5286 = sst [smem:[#allocation11_spill]] %s4169_s1  ;;  %s3178_s29 = sadd.s32 4294967295, %s4181_s28   ;;  %s4181_s28 = sphi %s4288_s28, %s35_s28   ;;  %s4177_s27 = sphi %s4286_s27, %s5297_s27   ;;  %s4173_s26 = sphi %s4284_s26, %s5296_s26   ;;  %s4169_s1 = sphi %s4282_s1, %s5295_s1   ;;  %s4165_s25 = sphi %s4280_s25, %s5299_s25   ;;  %s4161_s0 = sphi %s4278_s0, %s5298_s0  }
  0x14   : > { %5287 = sst [smem:[#allocation12_spill]] %s4177_s27  ;;  %s3179_s30 = sadd.s32 4294967294, %s4181_s28  }
  0x15   : > { %s47_s16 = sadd.s32 1, %s4177_s27  ;;  %s343_s17 = sadd.s32 1, %s4169_s1 }
  0x16   : > { %p49_p5 = scmp.ge.s32.totalorder %s47_s16, 4  ;;  %p353_p6 = scmp.ne.s32.totalorder %s4169_s1, %s4165_s25 }
  0x17   : > { %p354_p7 = scmp.eq.s32.totalorder %s3178_s29, 3  ;;  %p359_p8 = scmp.ne.s32.totalorder %s4165_s25, %s4161_s0 }
  0x18   : > { %s5301_s16 = smov (%p49_p5, %s47_s16), 0  ;;  %p360_p10 = scmp.eq.s32.totalorder %s3179_s30, 3 }
  0x19   : > { %5288 = sst [smem:[#allocation13_spill]] %s5301_s16  ;;  %p4318_p9 = por %p354_p7, %p353_p6 }
  0x1a   : > { %s338_s19 = ssub.s32 %s4177_s27, %s5301_s16  ;;  %p3182_p11 = scmp.ge.s32.totalorder %s4181_s28, 1 }
  0x1b   : > { %p341_p12 = scmp.eq.s32.totalorder %s338_s19, 0  ;;  %p4325_p13 = por %p360_p10, %p359_p8 }
  0x1c   : > { %p432_p0 = scmp.lt.s32.totalorder %s4181_s28, 5 }
  0x1d   : > { %s5290_s20 = scalar_select %p4325_p13, 1, 0 }
  0x1e   : > { %s4331_s21 = scalar_select %p341_p12, %s4169_s1, %s343_s17  }
  0x1f   : > { %5291 = sst [smem:[#allocation14_spill]] %s5290_s20  ;;  %p433_p1 = pnand %p3182_p11, %p432_p0 }
  0x20   : > { %5292 = sst [smem:[#allocation15_spill]] %s4331_s21  ;;  %p485_p2 = scmp.lt.s32.totalorder (!%p433_p1), %s4173_s26, 3  ;;  %vm670_vm0 = vcmask (!%p433_p1), 523264   ;;  %v3909_v0 = vld [vmem:[%s5268_s2] sm:$0xff] (!%p433_p1)   ;;  %v4184_v2 = vmov (!%p433_p1), 0   ;;  %v829_v4 = vld [vmem:[%s5269_s3 + $0x8] sm:$0xff] (!%p433_p1) }
  0x21   : > { %436 = sbr.rel (%p433_p1) target bundleno = 3398 (0xd46), region = 72  ;;  %s493_s24 = sld [smem:[#allocation5 + %s4173_s26]] (!%p433_p1)  ;;  %v828_v1 = vld [vmem:[%s5269_s3] sm:$0xff] (!%p433_p1)  ;;  %3500 = vmatprep.mubr.msk.bf16.mxu1 (!%p433_p1), %vm670_vm0, %v3909_v0  ;;  %3907 = vset.pattern.permute.xlu0 (!%p433_p1), %v4184_v2  ;;  %v535_v11 = vld [vmem:[%s5271_s5 + $0x8] sm:$0xff] (!%p433_p1)  ;;  %v3913_v33 = vld [vmem:[%s5268_s2 + $0x10] sm:$0xff] (!%p433_p1)   ;;  %vm1002_vm1 = vcmask (!%p433_p1), 130048  }
  0x22   : > { %v3911_v3 = vld [vmem:[%s5270_s4] sm:$0xff] (!%p433_p1)   ;;  %838 = vperm.xlu0 (!%p433_p1), %3907, %v828_v1   ;;  %3908 = vset.pattern.permute.xlu1 (!%p433_p1), %v4184_v2  ;;  %v3910_v30 = vld [vmem:[%s5268_s2 + $0x8] sm:$0xff] (!%p433_p1)   ;;  %v3914_v34 = vld [vmem:[%s5268_s2 + $0x18] sm:$0xff] (!%p433_p1)   ;;  %s978_s1 = sld [smem:[#allocation6]] (!%p433_p1)  ;;  %vm4187_vm3 = vmmov (!%p433_p1), 0   ;;  %s482_s21 = sand.u32 (!%p433_p1), 1, %s4165_s25  }
  0x23   : > { %3476 = vmatprep.mubr.msk.bf16.mxu0 (!%p433_p1), %vm670_vm0, %v3911_v3  ;;  %v534_v5 = vld [vmem:[%s5271_s5] sm:$0xff] (!%p433_p1)  ;;  %v3912_v32 = vld [vmem:[%s5270_s4 + $0x8] sm:$0xff] (!%p433_p1)   ;;  %v3915_v1 = vld [vmem:[%s5270_s4 + $0x10] sm:$0xff] (!%p433_p1)   ;;  %s3183_s30 = sshll.u32 (!%p433_p1), %s482_s21, 6 }
  0x24   : > { %552 = vperm.xlu1 (!%p433_p1), %3908, %v534_v5   ;;  %v3916_v2 = vld [vmem:[%s5270_s4 + $0x18] sm:$0xff] (!%p433_p1)   ;;  %v3917_v3 = vld [vmem:[%s5270_s4 + $0x20] sm:$0xff] (!%p433_p1)   ;;  %v979_v5 = vlaneseq (!%p433_p1) }
  0x26   : > { %843 = vperm.xlu0 (!%p433_p1), %3907, %v829_v4   ;;  %v3918_v4 = vld [vmem:[%s5270_s4 + $0x28] sm:$0xff] (!%p433_p1)  }
  0x27   : > { %p494_p3 = scmp.lt.s32.totalorder (!%p433_p1), %s493_s24, 3 }
  0x28   : > { %s486_s29 = scalar_select %p485_p2, %s4173_s26, 3  ;;  %557 = vperm.xlu1 %3908, %v535_v11  }
  0x29   : > { %s5303_s24 = smov (!%p494_p3, %s493_s24), 3 }
  0x2a   : > { %s3293_s27 = sshll.u32 %s486_s29, 6  ;;  %s3294_s20 = sshll.u32 %s5303_s24, 6 }
  0x2b   : > { %s4349_s23 = scalar_lea.vmem %s5279_s13, %s3293_s27  ;;  %s498_s19 = scalar_lea.vmem %s5280_s14, %s3294_s20 }
  0x2c   : > { %v808_v6 = vld [vmem:[%s4349_s23] sm:$0xff]  ;;  %v809_v7 = vld [vmem:[%s4349_s23 + $0x8] sm:$0xff]  ;;  %v810_v8 = vld [vmem:[%s4349_s23 + $0x10] sm:$0xff]  ;;  %s3295_s24 = sshll.u32 %s4173_s26, 10  ;;  %s5220_s26 = scalar_lea.sflag [#allocation8], %s482_s21 }
  0x2d   : > { %v4361_v9 = vpack.c.bf16 %v809_v7, %v808_v6  ;;  %v811_v10 = vld [vmem:[%s4349_s23 + $0x18] sm:$0xff]  ;;  %v812_v13 = vld [vmem:[%s4349_s23 + $0x20] sm:$0xff]  ;;  %v813_v14 = vld [vmem:[%s4349_s23 + $0x28] sm:$0xff]  ;;  %v980_v6 = vand.u32 127, %v979_v5  ;;  %v981_v7 = vstv %s978_s1  ;;  %s5210_s29 = scalar_lea.hbm %s5281_s15, %s3295_s24  ;;  %s4189_s27 = smov [#allocation7]  }
  0x2e   : > { %v4367_v12 = vpack.c.bf16 %v811_v10, %v810_v8  ;;  %v814_v15 = vld [vmem:[%s4349_s23 + $0x30] sm:$0xff]  ;;  %v4375_v16 = vpack.c.bf16 %v813_v14, %v812_v13  ;;  %v815_v17 = vld [vmem:[%s4349_s23 + $0x38] sm:$0xff]  ;;  %v506_v18 = vld [vmem:[%s498_s19] sm:$0xff]  ;;  %v4185_v8 = vmov -1e+30   ;;  %s4105_s20 = sshll.u32 %s4189_s27, 4  ;;  %s4106_s20 = int_to_ptr.vmem [resolvable:$false] %s4105_s20 }
  0x2f   : > { %3492 = vmatprep.subr.bf16.mxu1 %v4361_v9  ;;  %v507_v19 = vld [vmem:[%s498_s19 + $0x8] sm:$0xff]  ;;  %v508_v20 = vld [vmem:[%s498_s19 + $0x10] sm:$0xff]  ;;  %v509_v22 = vld [vmem:[%s498_s19 + $0x18] sm:$0xff]  ;;  %v4383_v23 = vpack.c.bf16 %v815_v17, %v814_v15  ;;  %vm982_vm2 = vcmp.lt.s32.totalorder %v980_v6, %v981_v7 }
  0x30   : > { %3493 = vmatpush3.bf16.msra.mxu1 %v4361_v9  ;;  %v514_v21 = vpack.c.bf16 %v507_v19, %v506_v18  ;;  %v515_v24 = vpack.c.bf16 %v509_v22, %v508_v20  ;;  %v510_v25 = vld [vmem:[%s498_s19 + $0x20] sm:$0xff]  ;;  %v511_v26 = vld [vmem:[%s498_s19 + $0x28] sm:$0xff]  ;;  %v512_v27 = vld [vmem:[%s498_s19 + $0x30] sm:$0xff]  ;;  %v4445_v10 = vsel %vm982_vm2, 0.0, %v4185_v8 }
  0x31   : > { %3494 = vmatprep.subr.bf16.mxu1 %v4367_v12  ;;  %v513_v28 = vld [vmem:[%s498_s19 + $0x38] sm:$0xff]  ;;  %v516_v29 = vpack.c.bf16 %v511_v26, %v510_v25  ;;  %v3919_v6 = vld [vmem:[%s5270_s4 + $0x30] sm:$0xff]   ;;  %s5193_s19 = scalar_lea.vmem [#allocation7], %s3183_s30  ;;  %s4107_s30 = scalar_lea.vmem %s4106_s20, 2048 }
  0x32   : > { %3468 = vmatprep.subr.bf16.mxu0 %v514_v21  ;;  %v517_v31 = vpack.c.bf16 %v513_v28, %v512_v27  ;;  %v3920_v7 = vld [vmem:[%s5270_s4 + $0x38] sm:$0xff]   ;;  %s3088_s17 = sshll.u32 %s5193_s19, 4  ;;  %s5212_s17 = int_to_ptr.vmem [resolvable:$true] %s3088_s17 }
  0x33   : > { %3469 = vmatpush3.bf16.msra.mxu0 %v514_v21  ;;  %s4101_s1 = scalar_lea.vmem %s5212_s17, 1024  ;;  %p4108_p7 = scmp.lt.s32.totalorder %s5212_s17, %s4106_s20 }
  0x34   : > { %3495 = vmatpush3.bf16.msra.mxu1 %v4367_v12  ;;  %3470 = vmatprep.subr.bf16.mxu0 %v515_v24  ;;  %p4102_p4 = scmp.ne.s32.totalorder %s5212_s17, %s4101_s1  ;;  %p4109_p8 = scmp.lt.s32.totalorder %s4107_s30, %s4101_s1 }
  0x35   : > { %3496 = vmatprep.subr.bf16.mxu1 %v4375_v16 }
  0x36   : > { %p4103_p5 = pnand %p4102_p4, %p4318_p9  ;;  %p4110_p10 = por %p4109_p8, %p4108_p7 }
  0x37   : > { %3471 = vmatpush3.bf16.msra.mxu0 %v515_v24 }
  0x38   : > { %3497 = vmatpush3.bf16.msra.mxu1 %v4375_v16  ;;  %3472 = vmatprep.subr.bf16.mxu0 %v516_v29  ;;  %p4104_p6 = pneg %p4103_p5 }
  0x39   : > { %3498 = vmatprep.subr.bf16.mxu1 %v4383_v23 }
  0x3a   : > { %p4111_p11 = pnand %p4110_p10, %p4104_p6 }
  0x3b   : > { %3473 = vmatpush3.bf16.msra.mxu0 %v516_v29 }
  0x3c   : > { %3499 = vmatpush3.bf16.msra.mxu1 %v4383_v23  ;;  %3474 = vmatprep.subr.bf16.mxu0 %v517_v31 }
  0x3f   : > { %3501 = vmatmul.mubr.msk.bf16.vlgmr.msra.gmra.mrb[0].mxu1 %vm670_vm0, %v3910_v30  ;;  %3475 = vmatpush3.bf16.msra.mxu0 %v517_v31 }
  0x40   : > { %3504 = vmatprep.mubr.msk.bf16.mxu1 %vm670_vm0, %v3913_v33 }
  0x42   : > { %3477 = vmatmul.mubr.msk.bf16.vlgmr.msra.gmra.mrb[0].mxu0 %vm670_vm0, %v3912_v32 }
  0x43   : > { %3480 = vmatprep.mubr.msk.bf16.mxu0 %vm670_vm0, %v3915_v1 }
  0x47   : > { %3505 = vmatmul.mubr.msk.bf16.gmra.mrb[4].mxu1 %vm670_vm0, %v3914_v34 }
  0x4a   : > { %3481 = vmatmul.mubr.msk.bf16.gmra.mrb[4].mxu0 %vm670_vm0, %v3916_v2  ;;  %v542_v2 = vld [vmem:[%s5271_s5 + $0x40] sm:$0xff] }
  0x4b   : > { %3484 = vmatprep.mubr.msk.bf16.mxu0 %vm670_vm0, %v3917_v3  ;;  %v536_v3 = vld [vmem:[%s5271_s5 + $0x10] sm:$0xff] }
  0x52   : > { %3485 = vmatmul.mubr.msk.bf16.gmra.mrb[8].mxu0 %vm670_vm0, %v3918_v4  ;;  %v537_v4 = vld [vmem:[%s5271_s5 + $0x18] sm:$0xff] }
  0x53   : > { %3488 = vmatprep.mubr.msk.bf16.mxu0 %vm670_vm0, %v3919_v6 }
  0x5a   : > { %3489 = vmatmul.mubr.msk.bf16.gmra.mrb[12].mxu0 %vm670_vm0, %v3920_v7 }
  0xa1   : > { %v839_v35 = vpop.permute.xlu0 %838 }
  0xa3   : > { %v553_v39 = vpop.permute.xlu1 %552 }
  0xa5   : > { %v844_v40 = vpop.permute.xlu0 %843 }
  0xa7   : > { %v558_v47 = vpop.permute.xlu1 %557 }
 0x112   : > { %v4404_v36 = vpop.f32.mrb[0].mxu1 }
 0x113   : > { %v943_v37 = vpop.f32.mrb[1].mxu1 }
 0x114   : > { %v4406_v38 = vpop.f32.mrb[2].mxu1  ;;  %v944_v42 = vadd.f32 %v943_v37, %v839_v35 }
 0x115   : > { %v946_v41 = vpop.f32.mrb[3].mxu1  ;;  %v4408_v45 = vpop.f32.mrb[0].mxu0 }
 0x116   : > { %v947_v43 = vadd.f32 %v946_v41, %v844_v40  ;;  %v729_v46 = vpop.f32.mrb[1].mxu0 }
 0x117   : > { %v730_v48 = vadd.f32 %v729_v46, %v553_v39  ;;  %v4410_v49 = vpop.f32.mrb[2].mxu0  ;;  %v831_v46 = vld [vmem:[%s5269_s3 + $0x18] sm:$0xff] }
 0x118   : > { %v974_v44 = vpack.c.bf16 %v947_v43, %v944_v42  ;;  %v732_v50 = vpop.f32.mrb[3].mxu0 }
 0x119   : > { %v733_v51 = vadd.f32 %v732_v50, %v558_v47  ;;  %v830_v47 = vld [vmem:[%s5269_s3 + $0x10] sm:$0xff] }
 0x11a   : > { %986 = vxpose.xlu0.c.b16.start.end [1/1] (short) %v974_v44, 128  ;;  %v4412_v53 = vpop.f32.mrb[4].mxu1  ;;  %v4186_v44 = vmov 0.0  }
 0x11b   : > { %v792_v52 = vpack.c.bf16 %v733_v51, %v730_v48  ;;  %v4414_v54 = vpop.f32.mrb[5].mxu1  ;;  %3526 = vmatprep.subr.bf16.mxu0 %v4186_v44  ;;  %3542 = vmatprep.mubr.msk.bf16.mxu0 %vm4187_vm3, %v4186_v44 }
 0x11c   : > { %v4416_v55 = vpop.f32.mrb[6].mxu1 }
 0x11d   : > { %3508 = vmatprep.subr.bf16.mxu1 %v792_v52  ;;  %v4418_v56 = vpop.f32.mrb[7].mxu1 }
 0x11e   : > { %3509 = vmatpush3.bf16.msra.mxu1 %v792_v52 }
 0x11f   : > { %3546 = vmatprep.subr.bf16.mxu1 %v4186_v44 }
 0x180   : > { %v994_v57 = vpop.trf.xlu0 }
 0x181   : > { %3510 = vmatprep.mubr.msk.bf16.mxu1 %vm1002_vm1, %v994_v57  ;;  %v4518_v57 = vpop.f32.mrb[4].mxu0 }
 0x184   : > { %v995_v58 = vpop.trf.xlu0 }
 0x185   : > { %3511 = vmatmul.mubr.msk.bf16.vlgmr.msra.gmra.mrb[8].mxu1 %vm1002_vm1, %v995_v58  ;;  %v4520_v58 = vpop.f32.mrb[5].mxu0 }
 0x188   : > { %v996_v59 = vpop.trf.xlu0 }
 0x189   : > { %3514 = vmatprep.mubr.msk.bf16.mxu1 %vm1002_vm1, %v996_v59  ;;  %v4522_v59 = vpop.f32.mrb[6].mxu0 }
 0x18c   : > { %v997_v60 = vpop.trf.xlu0 }
 0x18d   : > { %3515 = vmatmul.mubr.msk.bf16.gmra.mrb[12].mxu1 %vm1002_vm1, %v997_v60  ;;  %v4524_v60 = vpop.f32.mrb[7].mxu0 }
 0x190   : > { %v998_v61 = vpop.trf.xlu0 }
 0x191   : > { %3518 = vmatprep.mubr.msk.bf16.mxu1 %vm1002_vm1, %v998_v61  ;;  %v4527_v61 = vpop.f32.mrb[8].mxu0 }
 0x194   : > { %v999_v62 = vpop.trf.xlu0 }
 0x195   : > { %3519 = vmatmul.mubr.msk.bf16.gmra.mrb[16].mxu1 %vm1002_vm1, %v999_v62  ;;  %v543_v62 = vld [vmem:[%s5271_s5 + $0x48] sm:$0xff] }
 0x198   : > { %v1000_v63 = vpop.trf.xlu0 }
 0x199   : > { %3522 = vmatprep.mubr.msk.bf16.mxu1 %vm1002_vm1, %v1000_v63  ;;  %v4532_v63 = vpop.f32.mrb[9].mxu0 }
 0x19c   : > { %v1001_v0 = vpop.trf.xlu0 }
 0x19d   : > { %3523 = vmatmul.mubr.msk.bf16.gmra.mrb[20].mxu1 %vm1002_vm1, %v1001_v0  ;;  %v4534_v0 = vpop.f32.mrb[10].mxu0 }
 0x19e   : > { %v4536_v1 = vpop.f32.mrb[11].mxu0  ;;  %3562 = vmatprep.mubr.msk.bf16.mxu1 %vm4187_vm3, %v4186_v44 }
 0x258   : > { %v3512_v11 = vpop.f32.mrb[8].mxu1 }
 0x259   : > { %v4448_v13 = vadd.f32 %v3512_v11, %v4445_v10  ;;  %v1061_v14 = vpop.f32.mrb[9].mxu1 }
 0x25a   : > { %v3513_v15 = vpop.f32.mrb[10].mxu1  ;;  %v4455_v19 = vadd.f32 %v1061_v14, %v4445_v10 }
 0x25b   : > { %1128 = vmax.xlane.f32.xlu1 %v4448_v13  ;;  %v1064_v17 = vpop.f32.mrb[11].mxu1  ;;  %v4460_v21 = vadd.f32 %v3513_v15, %v4445_v10 }
 0x25c   : > { %v4452_v18 = vadd.f32 %v1064_v17, %v4445_v10 }
 0x25e   : > { %1126 = vmax.xlane.f32.xlu0 %v4452_v18 }
 0x25f   : > { %1124 = vmax.xlane.f32.xlu1 %v4455_v19 }
 0x260   : > { %v3516_v20 = vpop.f32.mrb[12].mxu1 }
 0x261   : > { %v1077_v22 = vpop.f32.mrb[13].mxu1  ;;  %v4463_v25 = vadd.f32 %v3516_v20, %v4445_v10 }
 0x262   : > { %v3517_v24 = vpop.f32.mrb[14].mxu1  ;;  %v4468_v28 = vadd.f32 %v1077_v22, %v4445_v10 }
 0x263   : > { %1130 = vmax.xlane.f32.xlu1 %v4460_v21  ;;  %v1080_v26 = vpop.f32.mrb[15].mxu1  ;;  %v4475_v33 = vadd.f32 %v3517_v24, %v4445_v10 }
 0x264   : > { %v4480_v35 = vadd.f32 %v1080_v26, %v4445_v10 }
 0x267   : > { %1136 = vmax.xlane.f32.xlu1 %v4463_v25 }
 0x268   : > { %v3520_v27 = vpop.f32.mrb[16].mxu1 }
 0x269   : > { %v1093_v29 = vpop.f32.mrb[17].mxu1  ;;  %v4483_v40 = vadd.f32 %v3520_v27, %v4445_v10 }
 0x26a   : > { %v3521_v30 = vpop.f32.mrb[18].mxu1  ;;  %v4488_v42 = vadd.f32 %v1093_v29, %v4445_v10 }
 0x26b   : > { %v4471_v31 = vadd.f32 %v3521_v30, %v4445_v10  ;;  %1132 = vmax.xlane.f32.xlu1 %v4468_v28  ;;  %v1096_v32 = vpop.f32.mrb[19].mxu1 }
 0x26c   : > { %v4492_v43 = vadd.f32 %v1096_v32, %v4445_v10 }
 0x26d   : > { %1146 = vmax.xlane.f32.xlu0 %v4471_v31 }
 0x26f   : > { %1138 = vmax.xlane.f32.xlu1 %v4475_v33 }
 0x270   : > { %v3524_v34 = vpop.f32.mrb[20].mxu1 }
 0x271   : > { %v1109_v37 = vpop.f32.mrb[21].mxu1  ;;  %v4512_v51 = vadd.f32 %v3524_v34, %v4445_v10 }
 0x272   : > { %v3525_v39 = vpop.f32.mrb[22].mxu1  ;;  %v4515_v52 = vadd.f32 %v1109_v37, %v4445_v10 }
 0x273   : > { %1134 = vmax.xlane.f32.xlu1 %v4480_v35  ;;  %v1112_v41 = vpop.f32.mrb[23].mxu1  ;;  %v4507_v50 = vadd.f32 %v3525_v39, %v4445_v10 }
 0x274   : > { %v4504_v48 = vadd.f32 %v1112_v41, %v4445_v10 }
 0x277   : > { %1144 = vmax.xlane.f32.xlu1 %v4483_v40 }
 0x27b   : > { %1140 = vmax.xlane.f32.xlu1 %v4488_v42 }
 0x27f   : > { %1142 = vmax.xlane.f32.xlu1 %v4492_v43 }
 0x283   : > { %853 = vperm.xlu0 %3907, %v831_v46  }
 0x290   : > { %848 = vperm.xlu1 %3908, %v830_v47  }
 0x2a2   : > { %1150 = vmax.xlane.f32.xlu0 %v4504_v48 }
 0x2a6   : > { %1154 = vmax.xlane.f32.xlu0 %v4507_v50 }
 0x2b4   : > { %1152 = vmax.xlane.f32.xlu1 %v4512_v51 }
 0x2b8   : > { %1148 = vmax.xlane.f32.xlu1 %v4515_v52 }
 0x2bc   : > { %597 = vperm.xlu0 %3907, %v543_v62  }
 0x2c9   : > { %592 = vperm.xlu1 %3908, %v542_v2  }
 0x2cd   : > { %562 = vperm.xlu1 %3908, %v536_v3  }
 0x2d1   : > { %567 = vperm.xlu1 %3908, %v537_v4  }
 0x2e8   : > { %v1129_v8 = vpop.xlane.xlu1 %1128 }
 0x2e9   : > { %v1158_v26 = vsub.f32 %v4448_v13, %v1129_v8 }
 0x2eb   : > { %v1127_v11 = vpop.xlane.xlu0 %1126  ;;  %v1176_v32 = vmul.f32 1.442695, %v1158_v26 }
 0x2ec   : > { %v1157_v14 = vsub.f32 %v4452_v18, %v1127_v11  ;;  %v1125_v15 = vpop.xlane.xlu1 %1124 }
 0x2ed   : > { %v1156_v17 = vsub.f32 %v4455_v19, %v1125_v15 }
 0x2ee   : > { %v1174_v20 = vmul.f32 1.442695, %v1157_v14 }
 0x2ef   : > { %v1172_v22 = vmul.f32 1.442695, %v1156_v17 }
 0x2f0   : > { %3945 = vpow2.f32 %v1174_v20  ;;  %v1131_v24 = vpop.xlane.xlu1 %1130 }
 0x2f1   : > { %3947 = vpow2.f32 %v1172_v22  ;;  %v1159_v27 = vsub.f32 %v4460_v21, %v1131_v24 }
 0x2f3   : > { %v1178_v29 = vmul.f32 1.442695, %v1159_v27 }
 0x2f4   : > { %v1137_v30 = vpop.xlane.xlu1 %1136 }
 0x2f5   : > { %3949 = vpow2.f32 %v1178_v29  ;;  %v1162_v6 = vsub.f32 %v4463_v25, %v1137_v30 }
 0x2f6   : > { %3951 = vpow2.f32 %v1176_v32 }
 0x2f7   : > { %v1184_v11 = vmul.f32 1.442695, %v1162_v6 }
 0x2f8   : > { %v1133_v34 = vpop.xlane.xlu1 %1132 }
 0x2f9   : > { %v1160_v39 = vsub.f32 %v4468_v28, %v1133_v34 }
 0x2fa   : > { %v3946_v37 = vpop.eup %3945 }
 0x2fb   : > { %v3948_v18 = vpop.eup %3947  ;;  %v1180_v13 = vmul.f32 1.442695, %v1160_v39 }
 0x2fc   : > { %v1139_v19 = vpop.xlane.xlu1 %1138  ;;  %v1204_v41 = vpack.c.bf16 %v3946_v37, %v3948_v18 }
 0x2fd   : > { %v1163_v2 = vsub.f32 %v4475_v33, %v1139_v19  ;;  %3953 = vpow2.f32 %v1180_v13 }
 0x2fe   : > { %3527 = vmatpush3.bf16.xpose.msra.mxu0 %v1204_v41  ;;  %3547 = vmatpush3.bf16.xpose.msra.mxu1 %v1204_v41 }
 0x2ff   : > { %3528 = vmatprep.subr.bf16.mxu0 %v4186_v44  ;;  %3548 = vmatprep.subr.bf16.mxu1 %v4186_v44  ;;  %v3950_v46 = vpop.eup %3949  ;;  %v1186_v7 = vmul.f32 1.442695, %v1163_v2 }
 0x300   : > { %v1135_v21 = vpop.xlane.xlu1 %1134  ;;  %v3952_v62 = vpop.eup %3951 }
 0x301   : > { %v1161_v47 = vsub.f32 %v4480_v35, %v1135_v21  ;;  %v1205_v28 = vpack.c.bf16 %v3950_v46, %v3952_v62  ;;  %v1147_v35 = vpop.xlane.xlu0 %1146 }
 0x303   : > { %v1182_v3 = vmul.f32 1.442695, %v1161_v47 }
 0x304   : > { %v1145_v4 = vpop.xlane.xlu1 %1144 }
 0x305   : > { %3955 = vpow2.f32 %v1182_v3  ;;  %v854_v25 = vpop.permute.xlu0 %853  ;;  %v1166_v32 = vsub.f32 %v4483_v40, %v1145_v4 }
 0x306   : > { %3529 = vmatpush3.bf16.xpose.msra.mxu0 %v1205_v28  ;;  %3549 = vmatpush3.bf16.xpose.msra.mxu1 %v1205_v28  ;;  %3957 = vpow2.f32 %v1186_v7  ;;  %v955_v27 = vadd.f32 %v4406_v38, %v854_v25 }
 0x307   : > { %3530 = vmatprep.subr.bf16.mxu0 %v4186_v44  ;;  %3550 = vmatprep.subr.bf16.mxu1 %v4186_v44  ;;  %3959 = vpow2.f32 %v1184_v11  ;;  %v3954_v17 = vpop.eup %3953  ;;  %v1192_v38 = vmul.f32 1.442695, %v1166_v32 }
 0x308   : > { %v1141_v8 = vpop.xlane.xlu1 %1140 }
 0x309   : > { %v1164_v33 = vsub.f32 %v4488_v42, %v1141_v8 }
 0x30b   : > { %v1188_v29 = vmul.f32 1.442695, %v1164_v33 }
 0x30c   : > { %v1143_v14 = vpop.xlane.xlu1 %1142 }
 0x30d   : > { %v1165_v15 = vsub.f32 %v4492_v43, %v1143_v14  ;;  %v1167_v43 = vsub.f32 %v4471_v31, %v1147_v35 }
 0x30f   : > { %v3956_v20 = vpop.eup %3955  ;;  %v1190_v22 = vmul.f32 1.442695, %v1165_v15  ;;  %v1194_v39 = vmul.f32 1.442695, %v1167_v43 }
 0x310   : > { %v849_v24 = vpop.permute.xlu1 %848  ;;  %v1206_v26 = vpack.c.bf16 %v3956_v20, %v3954_v17  ;;  %v3958_v42 = vpop.eup %3957 }
 0x311   : > { %v952_v30 = vadd.f32 %v4404_v36, %v849_v24  ;;  %3961 = vpow2.f32 %v1190_v22  ;;  %v3960_v37 = vpop.eup %3959 }
 0x312   : > { %3531 = vmatpush3.bf16.xpose.msra.mxu0 %v1206_v26  ;;  %3551 = vmatpush3.bf16.xpose.msra.mxu1 %v1206_v26  ;;  %3963 = vpow2.f32 %v1188_v29  ;;  %v1207_v18 = vpack.c.bf16 %v3958_v42, %v3960_v37  ;;  %v4610_v37 = vpop.f32.mrb[12].mxu0 }
 0x313   : > { %v975_v34 = vpack.c.bf16 %v955_v27, %v952_v30  ;;  %3532 = vmatprep.subr.bf16.mxu0 %v4186_v44  ;;  %3552 = vmatprep.subr.bf16.mxu1 %v4186_v44  ;;  %3965 = vpow2.f32 %v1192_v38  ;;  %v4612_v38 = vpop.f32.mrb[13].mxu0 }
 0x314   : > { %3967 = vpow2.f32 %v1194_v39 }
 0x315   : > { %1304 = vxpose.xlu0.c.b16.start.end [1/1] (short) %v975_v34, 128 }
 0x31a   : > { %3533 = vmatpush3.bf16.xpose.msra.mxu0 %v1207_v18  ;;  %3553 = vmatpush3.bf16.xpose.msra.mxu1 %v1207_v18  ;;  %v4614_v18 = vpop.f32.mrb[14].mxu0 }
 0x31b   : > { %3534 = vmatprep.subr.bf16.mxu0 %v4186_v44  ;;  %3554 = vmatprep.subr.bf16.mxu1 %v4186_v44  ;;  %v3962_v36 = vpop.eup %3961  ;;  %v4616_v39 = vpop.f32.mrb[15].mxu0 }
 0x31c   : > { %v3964_v40 = vpop.eup %3963 }
 0x31d   : > { %v1208_v19 = vpack.c.bf16 %v3962_v36, %v3964_v40  ;;  %v3966_v31 = vpop.eup %3965 }
 0x31e   : > { %v3968_v41 = vpop.eup %3967 }
 0x31f   : > { %v1209_v13 = vpack.c.bf16 %v3968_v41, %v3966_v31 }
 0x322   : > { %3535 = vmatpush3.bf16.xpose.msra.mxu0 %v1208_v19  ;;  %3555 = vmatpush3.bf16.xpose.msra.mxu1 %v1208_v19 }
 0x323   : > { %3536 = vmatprep.subr.bf16.mxu0 %v4186_v44  ;;  %3556 = vmatprep.subr.bf16.mxu1 %v4186_v44 }
 0x32a   : > { %3537 = vmatpush3.bf16.xpose.msra.mxu0 %v1209_v13  ;;  %3557 = vmatpush3.bf16.xpose.msra.mxu1 %v1209_v13 }
 0x32b   : > { %3538 = vmatprep.subr.bf16.mxu0 %v4186_v44  ;;  %3558 = vmatprep.subr.bf16.mxu1 %v4186_v44 }
 0x32f   : > { %v1151_v21 = vpop.xlane.xlu0 %1150 }
 0x330   : > { %v1169_v46 = vsub.f32 %v4504_v48, %v1151_v21 }
 0x332   : > { %v1198_v2 = vmul.f32 1.442695, %v1169_v46 }
 0x333   : > { %v1155_v62 = vpop.xlane.xlu0 %1154 }
 0x334   : > { %3969 = vpow2.f32 %v1198_v2  ;;  %v1171_v11 = vsub.f32 %v4507_v50, %v1155_v62 }
 0x336   : > { %v1202_v17 = vmul.f32 1.442695, %v1171_v11 }
 0x33b   : > { %v598_v28 = vpop.permute.xlu0 %597 }
 0x33c   : > { %v765_v35 = vadd.f32 %v4536_v1, %v598_v28 }
 0x33e   : > { %v3970_v20 = vpop.eup %3969 }
 0x341   : > { %v1153_v47 = vpop.xlane.xlu1 %1152 }
 0x342   : > { %v1170_v6 = vsub.f32 %v4512_v51, %v1153_v47  ;;  %v1295_v47 = vshrl.u32 %v979_v5, 7 }
 0x344   : > { %v1200_v48 = vmul.f32 1.442695, %v1170_v6  ;;  %v4619_v62 = vsub.s32 0, %v1295_v47 }
 0x345   : > { %v1149_v3 = vpop.xlane.xlu1 %1148 }
 0x346   : > { %v1168_v4 = vsub.f32 %v4515_v52, %v1149_v3 }
 0x348   : > { %v1196_v7 = vmul.f32 1.442695, %v1168_v4 }
 0x349   : > { %v593_v8 = vpop.permute.xlu1 %592 }
 0x34a   : > { %3971 = vpow2.f32 %v1196_v7  ;;  %v762_v14 = vadd.f32 %v4532_v63, %v593_v8 }
 0x34b   : > { %3973 = vpow2.f32 %v1200_v48 }
 0x34c   : > { %v796_v33 = vpack.c.bf16 %v765_v35, %v762_v14  ;;  %3975 = vpow2.f32 %v1202_v17 }
 0x34d   : > { %v563_v15 = vpop.permute.xlu1 %562 }
 0x34e   : > { %v738_v52 = vadd.f32 %v4408_v45, %v563_v15  ;;  %v4188_v45 = vmov 1065369472  }
 0x351   : > { %v568_v25 = vpop.permute.xlu1 %567 }
 0x352   : > { %v741_v51 = vadd.f32 %v4410_v49, %v568_v25 }
 0x354   : > { %v3972_v22 = vpop.eup %3971  ;;  %v793_v24 = vpack.c.bf16 %v741_v51, %v738_v52 }
 0x355   : > { %v1210_v50 = vpack.c.bf16 %v3970_v20, %v3972_v22  ;;  %v3974_v63 = vpop.eup %3973 }
 0x356   : > { %v3976_v1 = vpop.eup %3975 }
 0x357   : > { %3539 = vmatpush3.bf16.xpose.msra.mxu0 %v1210_v50  ;;  %3559 = vmatpush3.bf16.xpose.msra.mxu1 %v1210_v50  ;;  %v1211_v26 = vpack.c.bf16 %v3976_v1, %v3974_v63 }
 0x358   : > { %3540 = vmatprep.subr.bf16.mxu0 %v4186_v44  ;;  %3560 = vmatprep.subr.bf16.mxu1 %v4186_v44 }
 0x35f   : > { %3541 = vmatpush3.bf16.xpose.msra.mxu0 %v1211_v26  ;;  %3561 = vmatpush3.bf16.xpose.msra.mxu1 %v1211_v26 }
 0x360   : > { %3566 = vmatprep.subr.bf16.mxu1 %v793_v24  ;;  %3584 = vmatprep.subr.bf16.mxu0 %v4186_v44 }
 0x366   : > { %3543 = vmatmul.mubr.bf16.vlgmr.msra.gmra.mrb[16].mxu0 %v4188_v45  ;;  %3563 = vmatmul.mubr.bf16.vlgmr.msra.gmra.mrb[24].mxu1 %v796_v33 }
 0x367   : > { %3567 = vmatpush3.bf16.msra.mxu1 %v793_v24  ;;  %3600 = vmatprep.mubr.msk.bf16.mxu0 %vm4187_vm3, %v4186_v44 }
 0x368   : > { %3604 = vmatprep.subr.bf16.mxu1 %v4186_v44 }
 0x37b   : > { %v1312_v49 = vpop.trf.xlu0 }
 0x37c   : > { %3568 = vmatprep.mubr.msk.bf16.mxu1 %vm1002_vm1, %v1312_v49 }
 0x37f   : > { %v1313_v27 = vpop.trf.xlu0 }
 0x380   : > { %3569 = vmatmul.mubr.msk.bf16.vlgmr.msra.gmra.mrb[28].mxu1 %vm1002_vm1, %v1313_v27 }
 0x383   : > { %v1314_v29 = vpop.trf.xlu0 }
 0x384   : > { %3572 = vmatprep.mubr.msk.bf16.mxu1 %vm1002_vm1, %v1314_v29 }
 0x387   : > { %v1315_v30 = vpop.trf.xlu0 }
 0x388   : > { %3573 = vmatmul.mubr.msk.bf16.gmra.mrb[32].mxu1 %vm1002_vm1, %v1315_v30 }
 0x38b   : > { %v1316_v32 = vpop.trf.xlu0 }
 0x38c   : > { %3576 = vmatprep.mubr.msk.bf16.mxu1 %vm1002_vm1, %v1316_v32 }
 0x38f   : > { %v1317_v34 = vpop.trf.xlu0 }
 0x390   : > { %3577 = vmatmul.mubr.msk.bf16.gmra.mrb[36].mxu1 %vm1002_vm1, %v1317_v34 }
 0x393   : > { %v1318_v42 = vpop.trf.xlu0 }
 0x394   : > { %3580 = vmatprep.mubr.msk.bf16.mxu1 %vm1002_vm1, %v1318_v42 }
 0x397   : > { %v1319_v43 = vpop.trf.xlu0 }
 0x398   : > { %3581 = vmatmul.mubr.msk.bf16.gmra.mrb[40].mxu1 %vm1002_vm1, %v1319_v43 }
 0x399   : > { %3620 = vmatprep.mubr.msk.bf16.mxu1 %vm4187_vm3, %v4186_v44 }
 0x439   : > { %v1246_v36 = vpop.f32.mrb[16].mxu0  ;;  %v1286_v40 = vpop.f32.mrb[24].mxu1 }
 0x43a   : > { %3977 = vrcp.f32 %v1246_v36  ;;  %v3564_v19 = vpop.f32.mrb[25].mxu1  ;;  %v3544_v31 = vpop.f32.mrb[17].mxu0 }
 0x43b   : > { %v1289_v41 = vpop.f32.mrb[26].mxu1  ;;  %v1249_v13 = vpop.f32.mrb[18].mxu0  ;;  %v832_v19 = vld [vmem:[%s5269_s3 + $0x20] sm:$0xff] }
 0x43c   : > { %v3565_v21 = vpop.f32.mrb[27].mxu1  ;;  %v3545_v46 = vpop.f32.mrb[19].mxu0 }
 0x43d   : > { %v539_v21 = vld [vmem:[%s5271_s5 + $0x28] sm:$0xff]  ;;  %v538_v46 = vld [vmem:[%s5271_s5 + $0x20] sm:$0xff] }
 0x444   : > { %v3978_v2 = vpop.eup %3977 }
 0x445   : > { %v1297_v3 = vrot.slane %v3978_v2, %v4619_v62 }
 0x447   : > { %v1298_v4 = vmul.f32 %v1297_v3, %v1286_v40  ;;  %v1299_v28 = vmul.f32 %v1297_v3, %v1289_v41  ;;  %v833_v40 = vld [vmem:[%s5269_s3 + $0x28] sm:$0xff] }
 0x449   : > { %v4622_v6 = vpack.c.bf16 %v1299_v28, %v1298_v4 }
 0x453   : > { %v3570_v7 = vpop.f32.mrb[28].mxu1 }
 0x454   : > { %v4625_v8 = vadd.f32 %v3570_v7, %v4445_v10  ;;  %v1378_v11 = vpop.f32.mrb[29].mxu1 }
 0x455   : > { %v3571_v35 = vpop.f32.mrb[30].mxu1  ;;  %v1379_v48 = vadd.f32 %v1378_v11, %v4445_v10 }
 0x456   : > { %1445 = vmax.xlane.f32.xlu1 %v4625_v8  ;;  %v1381_v14 = vpop.f32.mrb[31].mxu1  ;;  %v1390_v15 = vadd.f32 %v3571_v35, %v4445_v10 }
 0x457   : > { %v1382_v5 = vadd.f32 %v1381_v14, %v4445_v10 }
 0x459   : > { %1443 = vmax.xlane.f32.xlu0 %v1382_v5 }
 0x45a   : > { %1441 = vmax.xlane.f32.xlu1 %v1379_v48 }
 0x45b   : > { %v3574_v33 = vpop.f32.mrb[32].mxu1 }
 0x45c   : > { %v1394_v17 = vpop.f32.mrb[33].mxu1  ;;  %v4632_v52 = vadd.f32 %v3574_v33, %v4445_v10 }
 0x45d   : > { %v3575_v25 = vpop.f32.mrb[34].mxu1  ;;  %v4636_v22 = vadd.f32 %v1394_v17, %v4445_v10 }
 0x45e   : > { %1447 = vmax.xlane.f32.xlu1 %v1390_v15  ;;  %v1397_v51 = vpop.f32.mrb[35].mxu1  ;;  %v4643_v26 = vadd.f32 %v3575_v25, %v4445_v10 }
 0x45f   : > { %v1398_v27 = vadd.f32 %v1397_v51, %v4445_v10 }
 0x462   : > { %1453 = vmax.xlane.f32.xlu1 %v4632_v52 }
 0x463   : > { %v3578_v20 = vpop.f32.mrb[36].mxu1 }
 0x464   : > { %v1410_v24 = vpop.f32.mrb[37].mxu1  ;;  %v4652_v42 = vadd.f32 %v3578_v20, %v4445_v10 }
 0x465   : > { %v3579_v50 = vpop.f32.mrb[38].mxu1  ;;  %v4657_v43 = vadd.f32 %v1410_v24, %v4445_v10 }
 0x466   : > { %v4639_v63 = vadd.f32 %v3579_v50, %v4445_v10  ;;  %1449 = vmax.xlane.f32.xlu1 %v4636_v22  ;;  %v1413_v1 = vpop.f32.mrb[39].mxu1 }
 0x467   : > { %v4661_v36 = vadd.f32 %v1413_v1, %v4445_v10 }
 0x468   : > { %1463 = vmax.xlane.f32.xlu0 %v4639_v63 }
 0x46a   : > { %1455 = vmax.xlane.f32.xlu1 %v4643_v26 }
 0x46b   : > { %v3582_v49 = vpop.f32.mrb[40].mxu1 }
 0x46c   : > { %v1426_v29 = vpop.f32.mrb[41].mxu1  ;;  %v4679_v13 = vadd.f32 %v3582_v49, %v4445_v10 }
 0x46d   : > { %v3583_v30 = vpop.f32.mrb[42].mxu1  ;;  %v4675_v41 = vadd.f32 %v1426_v29, %v4445_v10 }
 0x46e   : > { %1451 = vmax.xlane.f32.xlu1 %v1398_v27  ;;  %v1429_v32 = vpop.f32.mrb[43].mxu1  ;;  %v4671_v31 = vadd.f32 %v3583_v30, %v4445_v10 }
 0x46f   : > { %v4649_v34 = vadd.f32 %v1429_v32, %v4445_v10 }
 0x471   : > { %1467 = vmax.xlane.f32.xlu0 %v4649_v34 }
 0x472   : > { %1461 = vmax.xlane.f32.xlu1 %v4652_v42 }
 0x476   : > { %1457 = vmax.xlane.f32.xlu1 %v4657_v43 }
 0x47a   : > { %1459 = vmax.xlane.f32.xlu1 %v4661_v36 }
 0x487   : > { %863 = vperm.xlu0 %3907, %v833_v40  }
 0x48b   : > { %858 = vperm.xlu1 %3908, %v832_v19  }
 0x4a6   : > { %1471 = vmax.xlane.f32.xlu0 %v4671_v31 }
 0x4af   : > { %1465 = vmax.xlane.f32.xlu1 %v4675_v41 }
 0x4b3   : > { %1469 = vmax.xlane.f32.xlu1 %v4679_v13 }
 0x4bc   : > { %577 = vperm.xlu0 %3907, %v539_v21  }
 0x4c4   : > { %572 = vperm.xlu1 %3908, %v538_v46  }
 0x4e3   : > { %v1446_v47 = vpop.xlane.xlu1 %1445 }
 0x4e4   : > { %v1475_v14 = vsub.f32 %v4625_v8, %v1446_v47 }
 0x4e6   : > { %v1444_v2 = vpop.xlane.xlu0 %1443  ;;  %v1493_v51 = vmul.f32 1.442695, %v1475_v14 }
 0x4e7   : > { %v1474_v3 = vsub.f32 %v1382_v5, %v1444_v2  ;;  %v1442_v4 = vpop.xlane.xlu1 %1441 }
 0x4e8   : > { %v1473_v28 = vsub.f32 %v1379_v48, %v1442_v4 }
 0x4e9   : > { %v1491_v7 = vmul.f32 1.442695, %v1474_v3 }
 0x4ea   : > { %v1489_v11 = vmul.f32 1.442695, %v1473_v28 }
 0x4eb   : > { %3979 = vpow2.f32 %v1491_v7  ;;  %v1448_v35 = vpop.xlane.xlu1 %1447 }
 0x4ec   : > { %3981 = vpow2.f32 %v1489_v11  ;;  %v1476_v33 = vsub.f32 %v1390_v15, %v1448_v35 }
 0x4ee   : > { %v1495_v17 = vmul.f32 1.442695, %v1476_v33 }
 0x4ef   : > { %v1454_v25 = vpop.xlane.xlu1 %1453 }
 0x4f0   : > { %3983 = vpow2.f32 %v1495_v17 }
 0x4f1   : > { %3985 = vpow2.f32 %v1493_v51 }
 0x4f3   : > { %v1450_v20 = vpop.xlane.xlu1 %1449 }
 0x4f4   : > { %v1477_v5 = vsub.f32 %v4636_v22, %v1450_v20  ;;  %v1479_v22 = vsub.f32 %v4632_v52, %v1454_v25 }
 0x4f5   : > { %v3980_v24 = vpop.eup %3979  ;;  %v1464_v46 = vpop.xlane.xlu0 %1463 }
 0x4f6   : > { %v3982_v50 = vpop.eup %3981  ;;  %v1497_v8 = vmul.f32 1.442695, %v1477_v5 }
 0x4f7   : > { %v1456_v1 = vpop.xlane.xlu1 %1455  ;;  %v1521_v48 = vpack.c.bf16 %v3980_v24, %v3982_v50 }
 0x4f8   : > { %v1480_v32 = vsub.f32 %v4643_v26, %v1456_v1  ;;  %3987 = vpow2.f32 %v1497_v8 }
 0x4f9   : > { %3585 = vmatpush3.bf16.xpose.msra.mxu0 %v1521_v48  ;;  %3605 = vmatpush3.bf16.xpose.msra.mxu1 %v1521_v48 }
 0x4fa   : > { %3586 = vmatprep.subr.bf16.mxu0 %v4186_v44  ;;  %3606 = vmatprep.subr.bf16.mxu1 %v4186_v44  ;;  %v3984_v49 = vpop.eup %3983  ;;  %v1503_v47 = vmul.f32 1.442695, %v1480_v32 }
 0x4fb   : > { %v1452_v15 = vpop.xlane.xlu1 %1451  ;;  %v3986_v30 = vpop.eup %3985 }
 0x4fc   : > { %v1478_v29 = vsub.f32 %v1398_v27, %v1452_v15  ;;  %v1522_v21 = vpack.c.bf16 %v3984_v49, %v3986_v30  ;;  %v1501_v27 = vmul.f32 1.442695, %v1479_v22 }
 0x4fe   : > { %v1499_v40 = vmul.f32 1.442695, %v1478_v29  ;;  %v1468_v3 = vpop.xlane.xlu0 %1467 }
 0x4ff   : > { %v1462_v19 = vpop.xlane.xlu1 %1461  ;;  %v1486_v49 = vsub.f32 %v4649_v34, %v1468_v3 }
 0x500   : > { %3989 = vpow2.f32 %v1499_v40  ;;  %v1483_v20 = vsub.f32 %v4652_v42, %v1462_v19 }
 0x501   : > { %3587 = vmatpush3.bf16.xpose.msra.mxu0 %v1522_v21  ;;  %3607 = vmatpush3.bf16.xpose.msra.mxu1 %v1522_v21  ;;  %3991 = vpow2.f32 %v1503_v47  ;;  %v1515_v29 = vmul.f32 1.442695, %v1486_v49 }
 0x502   : > { %3588 = vmatprep.subr.bf16.mxu0 %v4186_v44  ;;  %3608 = vmatprep.subr.bf16.mxu1 %v4186_v44  ;;  %3993 = vpow2.f32 %v1501_v27  ;;  %v3988_v52 = vpop.eup %3987  ;;  %v1509_v5 = vmul.f32 1.442695, %v1483_v20 }
 0x503   : > { %v1458_v2 = vpop.xlane.xlu1 %1457 }
 0x504   : > { %v1481_v4 = vsub.f32 %v4657_v43, %v1458_v2 }
 0x506   : > { %v864_v7 = vpop.permute.xlu0 %863  ;;  %v1505_v17 = vmul.f32 1.442695, %v1481_v4 }
 0x507   : > { %v1460_v26 = vpop.xlane.xlu1 %1459  ;;  %v963_v25 = vadd.f32 %v4418_v56, %v864_v7 }
 0x508   : > { %v1482_v28 = vsub.f32 %v4661_v36, %v1460_v26  ;;  %v1484_v36 = vsub.f32 %v4639_v63, %v1464_v46 }
 0x50a   : > { %v3990_v11 = vpop.eup %3989  ;;  %v1507_v35 = vmul.f32 1.442695, %v1482_v28  ;;  %v1511_v1 = vmul.f32 1.442695, %v1484_v36 }
 0x50b   : > { %v859_v14 = vpop.permute.xlu1 %858  ;;  %v1523_v33 = vpack.c.bf16 %v3990_v11, %v3988_v52  ;;  %v3992_v43 = vpop.eup %3991 }
 0x50c   : > { %v960_v51 = vadd.f32 %v4414_v54, %v859_v14  ;;  %3995 = vpow2.f32 %v1507_v35  ;;  %v3994_v50 = vpop.eup %3993 }
 0x50d   : > { %3589 = vmatpush3.bf16.xpose.msra.mxu0 %v1523_v33  ;;  %3609 = vmatpush3.bf16.xpose.msra.mxu1 %v1523_v33  ;;  %3997 = vpow2.f32 %v1505_v17  ;;  %v1524_v56 = vpack.c.bf16 %v3992_v43, %v3994_v50 }
 0x50e   : > { %v976_v24 = vpack.c.bf16 %v963_v25, %v960_v51  ;;  %3590 = vmatprep.subr.bf16.mxu0 %v4186_v44  ;;  %3610 = vmatprep.subr.bf16.mxu1 %v4186_v44  ;;  %3999 = vpow2.f32 %v1509_v5 }
 0x50f   : > { %4001 = vpow2.f32 %v1511_v1 }
 0x510   : > { %1621 = vxpose.xlu1.c.b16.start.end [1/1] (short) %v976_v24, 128  ;;  %4003 = vpow2.f32 %v1515_v29 }
 0x515   : > { %3591 = vmatpush3.bf16.xpose.msra.mxu0 %v1524_v56  ;;  %3611 = vmatpush3.bf16.xpose.msra.mxu1 %v1524_v56 }
 0x516   : > { %3592 = vmatprep.subr.bf16.mxu0 %v4186_v44  ;;  %3612 = vmatprep.subr.bf16.mxu1 %v4186_v44  ;;  %v3996_v54 = vpop.eup %3995 }
 0x517   : > { %v3998_v42 = vpop.eup %3997 }
 0x518   : > { %v1525_v48 = vpack.c.bf16 %v3996_v54, %v3998_v42  ;;  %v4000_v63 = vpop.eup %3999 }
 0x519   : > { %v4002_v8 = vpop.eup %4001 }
 0x51a   : > { %v1526_v15 = vpack.c.bf16 %v4002_v8, %v4000_v63 }
 0x51d   : > { %3593 = vmatpush3.bf16.xpose.msra.mxu0 %v1525_v48  ;;  %3613 = vmatpush3.bf16.xpose.msra.mxu1 %v1525_v48 }
 0x51e   : > { %3594 = vmatprep.subr.bf16.mxu0 %v4186_v44  ;;  %3614 = vmatprep.subr.bf16.mxu1 %v4186_v44 }
 0x525   : > { %3595 = vmatpush3.bf16.xpose.msra.mxu0 %v1526_v15  ;;  %3615 = vmatpush3.bf16.xpose.msra.mxu1 %v1526_v15 }
 0x526   : > { %3596 = vmatprep.subr.bf16.mxu0 %v4186_v44  ;;  %3616 = vmatprep.subr.bf16.mxu1 %v4186_v44 }
 0x533   : > { %v1472_v40 = vpop.xlane.xlu0 %1471 }
 0x534   : > { %v1488_v22 = vsub.f32 %v4671_v31, %v1472_v40 }
 0x536   : > { %v1519_v26 = vmul.f32 1.442695, %v1488_v22  ;;  %v834_v22 = vld [vmem:[%s5269_s3 + $0x30] sm:$0xff] }
 0x53b   : > { %v578_v47 = vpop.permute.xlu0 %577 }
 0x53c   : > { %v1466_v30 = vpop.xlane.xlu1 %1465  ;;  %v749_v4 = vadd.f32 %v4524_v60, %v578_v47 }
 0x53d   : > { %v1485_v32 = vsub.f32 %v4675_v41, %v1466_v30  ;;  %v4004_v41 = vpop.eup %4003 }
 0x53f   : > { %v1513_v19 = vmul.f32 1.442695, %v1485_v32 }
 0x540   : > { %v1470_v21 = vpop.xlane.xlu1 %1469 }
 0x541   : > { %4005 = vpow2.f32 %v1513_v19  ;;  %v1487_v46 = vsub.f32 %v4679_v13, %v1470_v21 }
 0x543   : > { %v1517_v2 = vmul.f32 1.442695, %v1487_v46 }
 0x544   : > { %v573_v27 = vpop.permute.xlu1 %572 }
 0x545   : > { %v746_v34 = vadd.f32 %v4520_v58, %v573_v27  ;;  %4007 = vpow2.f32 %v1517_v2 }
 0x546   : > { %4009 = vpow2.f32 %v1519_v26 }
 0x547   : > { %v794_v3 = vpack.c.bf16 %v749_v4, %v746_v34 }
 0x54b   : > { %v4006_v28 = vpop.eup %4005 }
 0x54c   : > { %v1527_v52 = vpack.c.bf16 %v4004_v41, %v4006_v28 }
 0x54e   : > { %3597 = vmatpush3.bf16.xpose.msra.mxu0 %v1527_v52  ;;  %3617 = vmatpush3.bf16.xpose.msra.mxu1 %v1527_v52 }
 0x54f   : > { %3598 = vmatprep.subr.bf16.mxu0 %v4186_v44  ;;  %3618 = vmatprep.subr.bf16.mxu1 %v4186_v44  ;;  %v4008_v31 = vpop.eup %4007 }
 0x550   : > { %v4010_v13 = vpop.eup %4009 }
 0x551   : > { %v1528_v7 = vpack.c.bf16 %v4010_v13, %v4008_v31 }
 0x556   : > { %3599 = vmatpush3.bf16.xpose.msra.mxu0 %v1528_v7  ;;  %3619 = vmatpush3.bf16.xpose.msra.mxu1 %v1528_v7  ;;  %v835_v7 = vld [vmem:[%s5269_s3 + $0x38] sm:$0xff] }
 0x557   : > { %3624 = vmatprep.subr.bf16.mxu0 %v794_v3  ;;  %3662 = vmatprep.subr.bf16.mxu1 %v4186_v44 }
 0x55d   : > { %3601 = vmatmul.mubr.bf16.vlgmr.msra.gmra.mrb[20].mxu0 %v4188_v45 }
 0x55e   : > { %3625 = vmatpush3.bf16.msra.mxu0 %v794_v3 }
 0x55f   : > { %3642 = vmatprep.subr.bf16.mxu0 %v4186_v44 }
 0x576   : > { %v1629_v58 = vpop.trf.xlu1 }
 0x577   : > { %3626 = vmatprep.mubr.msk.bf16.mxu0 %vm1002_vm1, %v1629_v58  ;;  %v540_v58 = vld [vmem:[%s5271_s5 + $0x30] sm:$0xff] }
 0x57a   : > { %v1630_v60 = vpop.trf.xlu1 }
 0x57b   : > { %3627 = vmatmul.mubr.msk.bf16.vlgmr.msra.gmra.mrb[24].mxu0 %vm1002_vm1, %v1630_v60 }
 0x57e   : > { %v1631_v11 = vpop.trf.xlu1 }
 0x57f   : > { %3630 = vmatprep.mubr.msk.bf16.mxu0 %vm1002_vm1, %v1631_v11  ;;  %v541_v11 = vld [vmem:[%s5271_s5 + $0x38] sm:$0xff] }
 0x582   : > { %v1632_v35 = vpop.trf.xlu1 }
 0x583   : > { %3631 = vmatmul.mubr.msk.bf16.gmra.mrb[28].mxu0 %vm1002_vm1, %v1632_v35  ;;  %v544_v35 = vld [vmem:[%s5271_s5 + $0x50] sm:$0xff] }
 0x586   : > { %v1633_v14 = vpop.trf.xlu1 }
 0x587   : > { %3634 = vmatprep.mubr.msk.bf16.mxu0 %vm1002_vm1, %v1633_v14  ;;  %v545_v14 = vld [vmem:[%s5271_s5 + $0x58] sm:$0xff] }
 0x58a   : > { %v1634_v33 = vpop.trf.xlu1 }
 0x58b   : > { %3635 = vmatmul.mubr.msk.bf16.gmra.mrb[32].mxu0 %vm1002_vm1, %v1634_v33 }
 0x58e   : > { %v1635_v17 = vpop.trf.xlu1 }
 0x58f   : > { %3638 = vmatprep.mubr.msk.bf16.mxu0 %vm1002_vm1, %v1635_v17 }
 0x592   : > { %v1636_v25 = vpop.trf.xlu1 }
 0x593   : > { %3639 = vmatmul.mubr.msk.bf16.gmra.mrb[36].mxu0 %vm1002_vm1, %v1636_v25 }
 0x594   : > { %3658 = vmatprep.mubr.msk.bf16.mxu0 %vm4187_vm3, %v4186_v44 }
 0x630   : > { %v4731_v51 = vpop.f32.mrb[20].mxu0 }
 0x631   : > { %v3602_v20 = vpop.f32.mrb[21].mxu0 }
 0x632   : > { %v1566_v24 = vpop.f32.mrb[22].mxu0 }
 0x633   : > { %v3603_v43 = vpop.f32.mrb[23].mxu0 }
 0x64e   : > { %v3628_v36 = vpop.f32.mrb[24].mxu0 }
 0x64f   : > { %v4734_v50 = vadd.f32 %v3628_v36, %v4445_v10  ;;  %v1695_v5 = vpop.f32.mrb[25].mxu0 }
 0x650   : > { %v3629_v56 = vpop.f32.mrb[26].mxu0  ;;  %v1696_v42 = vadd.f32 %v1695_v5, %v4445_v10 }
 0x651   : > { %1762 = vmax.xlane.f32.xlu0 %v4734_v50  ;;  %v1698_v1 = vpop.f32.mrb[27].mxu0  ;;  %v1707_v63 = vadd.f32 %v3629_v56, %v4445_v10 }
 0x652   : > { %v1699_v54 = vadd.f32 %v1698_v1, %v4445_v10 }
 0x654   : > { %1760 = vmax.xlane.f32.xlu1 %v1699_v54 }
 0x655   : > { %1758 = vmax.xlane.f32.xlu0 %v1696_v42 }
 0x656   : > { %v3632_v48 = vpop.f32.mrb[28].mxu0 }
 0x657   : > { %v1711_v8 = vpop.f32.mrb[29].mxu0  ;;  %v4741_v49 = vadd.f32 %v3632_v48, %v4445_v10 }
 0x658   : > { %v3633_v15 = vpop.f32.mrb[30].mxu0  ;;  %v4745_v32 = vadd.f32 %v1711_v8, %v4445_v10 }
 0x659   : > { %1764 = vmax.xlane.f32.xlu0 %v1707_v63  ;;  %v1714_v29 = vpop.f32.mrb[31].mxu0  ;;  %v4752_v46 = vadd.f32 %v3633_v15, %v4445_v10 }
 0x65a   : > { %v1715_v2 = vadd.f32 %v1714_v29, %v4445_v10 }
 0x65d   : > { %1770 = vmax.xlane.f32.xlu0 %v4741_v49 }
 0x65e   : > { %v3636_v30 = vpop.f32.mrb[32].mxu0 }
 0x65f   : > { %v1727_v40 = vpop.f32.mrb[33].mxu0  ;;  %v4757_v4 = vadd.f32 %v3636_v30, %v4445_v10 }
 0x660   : > { %v3637_v19 = vpop.f32.mrb[34].mxu0  ;;  %v4761_v3 = vadd.f32 %v1727_v40, %v4445_v10 }
 0x661   : > { %1766 = vmax.xlane.f32.xlu0 %v4745_v32  ;;  %v1730_v21 = vpop.f32.mrb[35].mxu0  ;;  %v4765_v41 = vadd.f32 %v3637_v19, %v4445_v10 }
 0x662   : > { %v4769_v28 = vadd.f32 %v1730_v21, %v4445_v10 }
 0x665   : > { %868 = vperm.xlu1 %3908, %v834_v22   ;;  %1772 = vmax.xlane.f32.xlu0 %v4752_v46 }
 0x666   : > { %v3640_v47 = vpop.f32.mrb[36].mxu0 }
 0x667   : > { %v1743_v27 = vpop.f32.mrb[37].mxu0  ;;  %v4781_v13 = vadd.f32 %v3640_v47, %v4445_v10 }
 0x668   : > { %v3641_v26 = vpop.f32.mrb[38].mxu0  ;;  %v4777_v31 = vadd.f32 %v1743_v27, %v4445_v10 }
 0x669   : > { %1768 = vmax.xlane.f32.xlu0 %v1715_v2  ;;  %v1746_v34 = vpop.f32.mrb[39].mxu0  ;;  %v4791_v60 = vadd.f32 %v3641_v26, %v4445_v10 }
 0x66a   : > { %v4773_v52 = vadd.f32 %v1746_v34, %v4445_v10 }
 0x66d   : > { %1778 = vmax.xlane.f32.xlu0 %v4757_v4 }
 0x671   : > { %1774 = vmax.xlane.f32.xlu0 %v4761_v3 }
 0x675   : > { %1780 = vmax.xlane.f32.xlu0 %v4765_v41 }
 0x679   : > { %1776 = vmax.xlane.f32.xlu0 %v4769_v28 }
 0x67d   : > { %1784 = vmax.xlane.f32.xlu0 %v4773_v52 }
 0x689   : > { %1782 = vmax.xlane.f32.xlu1 %v4777_v31 }
 0x68d   : > { %1786 = vmax.xlane.f32.xlu1 %v4781_v13 }
 0x693   : > { %873 = vperm.xlu0 %3907, %v835_v7  }
 0x69e   : > { %582 = vperm.xlu1 %3908, %v540_v58  }
 0x6b2   : > { %1788 = vmax.xlane.f32.xlu0 %v4791_v60 }
 0x6c8   : > { %587 = vperm.xlu0 %3907, %v541_v11  }
 0x6cc   : > { %602 = vperm.xlu0 %3907, %v544_v35  }
 0x6d0   : > { %607 = vperm.xlu0 %3907, %v545_v14  }
 0x6de   : > { %v1763_v33 = vpop.xlane.xlu0 %1762 }
 0x6df   : > { %v1792_v56 = vsub.f32 %v4734_v50, %v1763_v33 }
 0x6e1   : > { %v1761_v17 = vpop.xlane.xlu1 %1760  ;;  %v1810_v15 = vmul.f32 1.442695, %v1792_v56 }
 0x6e2   : > { %v1791_v25 = vsub.f32 %v1699_v54, %v1761_v17  ;;  %v1759_v20 = vpop.xlane.xlu0 %1758 }
 0x6e3   : > { %v1790_v24 = vsub.f32 %v1696_v42, %v1759_v20 }
 0x6e4   : > { %v1808_v43 = vmul.f32 1.442695, %v1791_v25 }
 0x6e5   : > { %v1806_v36 = vmul.f32 1.442695, %v1790_v24 }
 0x6e6   : > { %4011 = vpow2.f32 %v1808_v43  ;;  %v1765_v5 = vpop.xlane.xlu0 %1764 }
 0x6e7   : > { %4013 = vpow2.f32 %v1806_v36  ;;  %v1793_v1 = vsub.f32 %v1707_v63, %v1765_v5 }
 0x6e9   : > { %v1812_v48 = vmul.f32 1.442695, %v1793_v1 }
 0x6ea   : > { %v1771_v8 = vpop.xlane.xlu0 %1770 }
 0x6eb   : > { %4015 = vpow2.f32 %v1812_v48 }
 0x6ec   : > { %4017 = vpow2.f32 %v1810_v15  ;;  %v869_v15 = vpop.permute.xlu1 %868 }
 0x6ee   : > { %v1767_v29 = vpop.xlane.xlu0 %1766 }
 0x6ef   : > { %v1794_v54 = vsub.f32 %v4745_v32, %v1767_v29  ;;  %v1796_v32 = vsub.f32 %v4741_v49, %v1771_v8  ;;  %v968_v29 = vadd.f32 %v4412_v53, %v869_v15 }
 0x6f0   : > { %v4012_v30 = vpop.eup %4011 }
 0x6f1   : > { %v4014_v40 = vpop.eup %4013  ;;  %v1814_v50 = vmul.f32 1.442695, %v1794_v54  ;;  %v1818_v35 = vmul.f32 1.442695, %v1796_v32 }
 0x6f2   : > { %v1773_v19 = vpop.xlane.xlu0 %1772  ;;  %v4805_v42 = vpack.c.bf16 %v4012_v30, %v4014_v40 }
 0x6f3   : > { %v1797_v27 = vsub.f32 %v4752_v46, %v1773_v19  ;;  %4019 = vpow2.f32 %v1814_v50 }
 0x6f4   : > { %3643 = vmatpush3.bf16.xpose.msra.mxu0 %v4805_v42 }
 0x6f5   : > { %3644 = vmatprep.subr.bf16.mxu0 %v4186_v44  ;;  %v4016_v63 = vpop.eup %4015  ;;  %v1820_v58 = vmul.f32 1.442695, %v1797_v27 }
 0x6f6   : > { %v1769_v21 = vpop.xlane.xlu0 %1768  ;;  %v4018_v47 = vpop.eup %4017 }
 0x6f7   : > { %v1795_v22 = vsub.f32 %v1715_v2, %v1769_v21  ;;  %v4810_v7 = vpack.c.bf16 %v4016_v63, %v4018_v47 }
 0x6f9   : > { %v1816_v26 = vmul.f32 1.442695, %v1795_v22 }
 0x6fa   : > { %v1779_v34 = vpop.xlane.xlu0 %1778 }
 0x6fb   : > { %4021 = vpow2.f32 %v1816_v26 }
 0x6fc   : > { %3645 = vmatpush3.bf16.xpose.msra.mxu0 %v4810_v7  ;;  %4023 = vpow2.f32 %v1820_v58 }
 0x6fd   : > { %3646 = vmatprep.subr.bf16.mxu0 %v4186_v44  ;;  %4025 = vpow2.f32 %v1818_v35  ;;  %v4020_v46 = vpop.eup %4019 }
 0x6fe   : > { %v1775_v11 = vpop.xlane.xlu0 %1774 }
 0x6ff   : > { %v1798_v2 = vsub.f32 %v4761_v3, %v1775_v11  ;;  %v1800_v3 = vsub.f32 %v4757_v4, %v1779_v34 }
 0x701   : > { %v1822_v17 = vmul.f32 1.442695, %v1798_v2  ;;  %v1826_v8 = vmul.f32 1.442695, %v1800_v3 }
 0x702   : > { %v1781_v14 = vpop.xlane.xlu0 %1780 }
 0x703   : > { %v1801_v24 = vsub.f32 %v4765_v41, %v1781_v14  ;;  %4027 = vpow2.f32 %v1822_v17 }
 0x705   : > { %v4022_v33 = vpop.eup %4021  ;;  %v1828_v56 = vmul.f32 1.442695, %v1801_v24 }
 0x706   : > { %v1777_v25 = vpop.xlane.xlu0 %1776  ;;  %v4816_v20 = vpack.c.bf16 %v4022_v33, %v4020_v46  ;;  %v4024_v36 = vpop.eup %4023 }
 0x707   : > { %v1799_v49 = vsub.f32 %v4769_v28, %v1777_v25  ;;  %v4026_v5 = vpop.eup %4025 }
 0x708   : > { %3647 = vmatpush3.bf16.xpose.msra.mxu0 %v4816_v20  ;;  %v4823_v48 = vpack.c.bf16 %v4024_v36, %v4026_v5 }
 0x709   : > { %v1824_v43 = vmul.f32 1.442695, %v1799_v49  ;;  %3648 = vmatprep.subr.bf16.mxu0 %v4186_v44 }
 0x70a   : > { %v1785_v1 = vpop.xlane.xlu0 %1784 }
 0x70b   : > { %4029 = vpow2.f32 %v1824_v43  ;;  %v1803_v41 = vsub.f32 %v4773_v52, %v1785_v1 }
 0x70c   : > { %4031 = vpow2.f32 %v1828_v56 }
 0x70d   : > { %4033 = vpow2.f32 %v1826_v8  ;;  %v4028_v30 = vpop.eup %4027  ;;  %v1832_v19 = vmul.f32 1.442695, %v1803_v41 }
 0x70f   : > { %4035 = vpow2.f32 %v1832_v19 }
 0x710   : > { %3649 = vmatpush3.bf16.xpose.msra.mxu0 %v4823_v48 }
 0x711   : > { %3650 = vmatprep.subr.bf16.mxu0 %v4186_v44 }
 0x712   : > { %v874_v28 = vpop.permute.xlu0 %873 }
 0x713   : > { %v971_v4 = vadd.f32 %v4416_v55, %v874_v28 }
 0x715   : > { %v4030_v40 = vpop.eup %4029  ;;  %v977_v54 = vpack.c.bf16 %v971_v4, %v968_v29 }
 0x716   : > { %v1783_v50 = vpop.xlane.xlu1 %1782  ;;  %v1842_v21 = vpack.c.bf16 %v4030_v40, %v4028_v30  ;;  %v4032_v52 = vpop.eup %4031 }
 0x717   : > { %v1802_v63 = vsub.f32 %v4777_v31, %v1783_v50  ;;  %1938 = vxpose.xlu1.c.b16.start.end [1/1] (short) %v977_v54, 128  ;;  %v4034_v53 = vpop.eup %4033 }
 0x718   : > { %3651 = vmatpush3.bf16.xpose.msra.mxu0 %v1842_v21  ;;  %v1843_v47 = vpack.c.bf16 %v4032_v52, %v4034_v53 }
 0x719   : > { %v1830_v22 = vmul.f32 1.442695, %v1802_v63  ;;  %3652 = vmatprep.subr.bf16.mxu0 %v4186_v44  ;;  %v4036_v55 = vpop.eup %4035 }
 0x71a   : > { %v1787_v31 = vpop.xlane.xlu1 %1786 }
 0x71b   : > { %4037 = vpow2.f32 %v1830_v22  ;;  %v1804_v34 = vsub.f32 %v4781_v13, %v1787_v31 }
 0x71d   : > { %v1834_v32 = vmul.f32 1.442695, %v1804_v34 }
 0x71e   : > { %v583_v2 = vpop.permute.xlu1 %582 }
 0x71f   : > { %4039 = vpow2.f32 %v1834_v32  ;;  %v754_v46 = vadd.f32 %v4518_v57, %v583_v2 }
 0x720   : > { %3653 = vmatpush3.bf16.xpose.msra.mxu0 %v1843_v47 }
 0x721   : > { %3654 = vmatprep.subr.bf16.mxu0 %v4186_v44 }
 0x725   : > { %v4038_v27 = vpop.eup %4037 }
 0x726   : > { %v1844_v26 = vpack.c.bf16 %v4036_v55, %v4038_v27 }
 0x728   : > { %3655 = vmatpush3.bf16.xpose.msra.mxu0 %v1844_v26 }
 0x729   : > { %3656 = vmatprep.subr.bf16.mxu0 %v4186_v44  ;;  %v4040_v49 = vpop.eup %4039 }
 0x73f   : > { %v1789_v58 = vpop.xlane.xlu0 %1788 }
 0x740   : > { %v1805_v11 = vsub.f32 %v4791_v60, %v1789_v58 }
 0x742   : > { %v1836_v35 = vmul.f32 1.442695, %v1805_v11 }
 0x744   : > { %4041 = vpow2.f32 %v1836_v35 }
 0x745   : > { %4043 = vrcp.f32 %v4731_v51 }
 0x747   : > { %v588_v14 = vpop.permute.xlu0 %587 }
 0x748   : > { %v757_v33 = vadd.f32 %v4522_v59, %v588_v14  ;;  %v547_v14 = vld [vmem:[%s5271_s5 + $0x68] sm:$0xff] }
 0x74a   : > { %v795_v17 = vpack.c.bf16 %v757_v33, %v754_v46 }
 0x74b   : > { %v603_v25 = vpop.permute.xlu0 %602 }
 0x74c   : > { %v770_v13 = vadd.f32 %v4527_v61, %v603_v25 }
 0x74e   : > { %v4042_v24 = vpop.eup %4041 }
 0x74f   : > { %v608_v43 = vpop.permute.xlu0 %607  ;;  %v1845_v36 = vpack.c.bf16 %v4042_v24, %v4040_v49  ;;  %v4044_v56 = vpop.eup %4043  ;;  %v546_v49 = vld [vmem:[%s5271_s5 + $0x60] sm:$0xff] }
 0x750   : > { %v773_v3 = vadd.f32 %v4534_v0, %v608_v43  ;;  %v1614_v1 = vrot.slane %v4044_v56, %v4619_v62  ;;  %v2278_v56 = vld [vmem:[%s5273_s7 + $0x28] sm:$0xff] }
 0x751   : > { %3657 = vmatpush3.bf16.xpose.msra.mxu0 %v1845_v36 }
 0x752   : > { %v797_v60 = vpack.c.bf16 %v773_v3, %v770_v13  ;;  %3682 = vmatprep.subr.bf16.mxu0 %v795_v17 }
 0x754   : > { %3621 = vmatmul.mubr.bf16.vlgmr.msra.gmra.mrb[44].mxu1 %v797_v60 }
 0x755   : > { %3663 = vmatpush3.bf16.xpose.msra.mxu1 %v4805_v42  ;;  %3678 = vmatprep.mubr.msk.bf16.mxu1 %vm4187_vm3, %v4186_v44 }
 0x756   : > { %3664 = vmatprep.subr.bf16.mxu1 %v4186_v44 }
 0x758   : > { %3659 = vmatmul.mubr.bf16.vlgmr.msra.gmra.mrb[40].mxu0 %v4188_v45 }
 0x759   : > { %3683 = vmatpush3.bf16.msra.mxu0 %v795_v17 }
 0x75a   : > { %3720 = vmatprep.subr.bf16.mxu0 %v4186_v44 }
 0x75d   : > { %3665 = vmatpush3.bf16.xpose.msra.mxu1 %v4810_v7 }
 0x75e   : > { %3666 = vmatprep.subr.bf16.mxu1 %v4186_v44 }
 0x765   : > { %3667 = vmatpush3.bf16.xpose.msra.mxu1 %v4816_v20 }
 0x766   : > { %3668 = vmatprep.subr.bf16.mxu1 %v4186_v44 }
 0x76d   : > { %3669 = vmatpush3.bf16.xpose.msra.mxu1 %v4823_v48 }
 0x76e   : > { %3670 = vmatprep.subr.bf16.mxu1 %v4186_v44 }
 0x775   : > { %3671 = vmatpush3.bf16.xpose.msra.mxu1 %v1842_v21 }
 0x776   : > { %3672 = vmatprep.subr.bf16.mxu1 %v4186_v44 }
 0x77d   : > { %3673 = vmatpush3.bf16.xpose.msra.mxu1 %v1843_v47  ;;  %v1946_v57 = vpop.trf.xlu1 }
 0x77e   : > { %3684 = vmatprep.mubr.msk.bf16.mxu0 %vm1002_vm1, %v1946_v57  ;;  %3674 = vmatprep.subr.bf16.mxu1 %v4186_v44  ;;  %v548_v57 = vld [vmem:[%s5271_s5 + $0x70] sm:$0xff] }
 0x781   : > { %v1947_v59 = vpop.trf.xlu1 }
 0x782   : > { %3685 = vmatmul.mubr.msk.bf16.vlgmr.msra.gmra.mrb[44].mxu0 %vm1002_vm1, %v1947_v59 }
 0x785   : > { %3675 = vmatpush3.bf16.xpose.msra.mxu1 %v1844_v26  ;;  %v1948_v61 = vpop.trf.xlu1 }
 0x786   : > { %3688 = vmatprep.mubr.msk.bf16.mxu0 %vm1002_vm1, %v1948_v61  ;;  %3676 = vmatprep.subr.bf16.mxu1 %v4186_v44  ;;  %v2273_v61 = vld [vmem:[%s5273_s7] sm:$0xff] }
 0x789   : > { %v1949_v0 = vpop.trf.xlu1 }
 0x78a   : > { %3689 = vmatmul.mubr.msk.bf16.gmra.mrb[48].mxu0 %vm1002_vm1, %v1949_v0 }
 0x78d   : > { %3677 = vmatpush3.bf16.xpose.msra.mxu1 %v1845_v36  ;;  %v1950_v42 = vpop.trf.xlu1 }
 0x78e   : > { %3692 = vmatprep.mubr.msk.bf16.mxu0 %vm1002_vm1, %v1950_v42  ;;  %3700 = vmatprep.subr.bf16.mxu1 %v4186_v44 }
 0x791   : > { %v1951_v7 = vpop.trf.xlu1 }
 0x792   : > { %3693 = vmatmul.mubr.msk.bf16.gmra.mrb[52].mxu0 %vm1002_vm1, %v1951_v7  ;;  %v2274_v7 = vld [vmem:[%s5273_s7 + $0x8] sm:$0xff] }
 0x795   : > { %v1952_v20 = vpop.trf.xlu1 }
 0x796   : > { %3696 = vmatprep.mubr.msk.bf16.mxu0 %vm1002_vm1, %v1952_v20  ;;  %v2276_v20 = vld [vmem:[%s5273_s7 + $0x18] sm:$0xff] }
 0x799   : > { %v1953_v5 = vpop.trf.xlu1 }
 0x79a   : > { %3697 = vmatmul.mubr.msk.bf16.gmra.mrb[56].mxu0 %vm1002_vm1, %v1953_v5 }
 0x79b   : > { %3736 = vmatprep.mubr.msk.bf16.mxu0 %vm4187_vm3, %v4186_v44 }
 0x827   : > { %v1603_v48 = vpop.f32.mrb[44].mxu1 }
 0x828   : > { %v1615_v8 = vmul.f32 %v1614_v1, %v1603_v48  ;;  %v3622_v15 = vpop.f32.mrb[45].mxu1  ;;  %v2777_v48 = vld [vmem:[%s5276_s10 + $0x8] sm:$0xff] }
 0x829   : > { %v1606_v41 = vpop.f32.mrb[46].mxu1  ;;  %v549_v15 = vld [vmem:[%s5271_s5 + $0x78] sm:$0xff] }
 0x82a   : > { %v1616_v28 = vmul.f32 %v1614_v1, %v1606_v41  ;;  %v3623_v29 = vpop.f32.mrb[47].mxu1  ;;  %v2280_v1 = vld [vmem:[%s5273_s7 + $0x38] sm:$0xff] }
 0x82b   : > { %v4868_v4 = vpop.f32.mrb[40].mxu0  ;;  %v2783_v41 = vld [vmem:[%s5276_s10 + $0x38] sm:$0xff]  ;;  %v2785_v29 = vld [vmem:[%s5276_s10 + $0x48] sm:$0xff] }
 0x82c   : > { %v4870_v30 = vpack.c.bf16 %v1616_v28, %v1615_v8  ;;  %v3660_v40 = vpop.f32.mrb[41].mxu0  ;;  %v2781_v8 = vld [vmem:[%s5276_s10 + $0x28] sm:$0xff]  ;;  %v2275_v28 = vld [vmem:[%s5273_s7 + $0x10] sm:$0xff] }
 0x82d   : > { %v1883_v54 = vpop.f32.mrb[42].mxu0  ;;  %v2277_v40 = vld [vmem:[%s5273_s7 + $0x20] sm:$0xff] }
 0x82e   : > { %v3661_v19 = vpop.f32.mrb[43].mxu0  ;;  %v2787_v54 = vld [vmem:[%s5276_s10 + $0x58] sm:$0xff] }
 0x82f   : > { %v2279_v19 = vld [vmem:[%s5273_s7 + $0x30] sm:$0xff] }
 0x855   : > { %v3686_v50 = vpop.f32.mrb[44].mxu0 }
 0x856   : > { %v4873_v21 = vadd.f32 %v3686_v50, %v4445_v10  ;;  %v2012_v51 = vpop.f32.mrb[45].mxu0  ;;  %v2789_v50 = vld [vmem:[%s5276_s10 + $0x68] sm:$0xff] }
 0x857   : > { %v3687_v63 = vpop.f32.mrb[46].mxu0  ;;  %v4880_v53 = vadd.f32 %v2012_v51, %v4445_v10  ;;  %v2776_v51 = vld [vmem:[%s5276_s10] sm:$0xff] }
 0x858   : > { %2079 = vmax.xlane.f32.xlu0 %v4873_v21  ;;  %v2015_v22 = vpop.f32.mrb[47].mxu0  ;;  %v4885_v55 = vadd.f32 %v3687_v63, %v4445_v10  ;;  %v2791_v63 = vld [vmem:[%s5276_s10 + $0x78] sm:$0xff] }
 0x859   : > { %v4877_v52 = vadd.f32 %v2015_v22, %v4445_v10  ;;  %v2778_v22 = vld [vmem:[%s5276_s10 + $0x10] sm:$0xff] }
 0x85b   : > { %2077 = vmax.xlane.f32.xlu1 %v4877_v52 }
 0x85c   : > { %2075 = vmax.xlane.f32.xlu0 %v4880_v53 }
 0x85d   : > { %v3690_v47 = vpop.f32.mrb[48].mxu0 }
 0x85e   : > { %v2028_v27 = vpop.f32.mrb[49].mxu0  ;;  %v4915_v13 = vadd.f32 %v3690_v47, %v4445_v10  ;;  %v2921_v47 = vld [vmem:[%s5278_s12 + $0x8] sm:$0xff] }
 0x85f   : > { %v3691_v26 = vpop.f32.mrb[50].mxu0  ;;  %v4888_v31 = vadd.f32 %v2028_v27, %v4445_v10  ;;  %v2780_v27 = vld [vmem:[%s5276_s10 + $0x20] sm:$0xff] }
 0x860   : > { %v2031_v34 = vpop.f32.mrb[51].mxu0  ;;  %2081 = vmax.xlane.f32.xlu0 %v4885_v55  ;;  %v4903_v24 = vadd.f32 %v3691_v26, %v4445_v10  ;;  %v2923_v26 = vld [vmem:[%s5278_s12 + $0x18] sm:$0xff] }
 0x861   : > { %v4893_v58 = vadd.f32 %v2031_v34, %v4445_v10  ;;  %v2782_v34 = vld [vmem:[%s5276_s10 + $0x30] sm:$0xff] }
 0x864   : > { %2083 = vmax.xlane.f32.xlu0 %v4888_v31 }
 0x865   : > { %v3694_v32 = vpop.f32.mrb[52].mxu0 }
 0x866   : > { %v2044_v11 = vpop.f32.mrb[53].mxu0  ;;  %v4930_v59 = vadd.f32 %v3694_v32, %v4445_v10 }
 0x867   : > { %v3695_v35 = vpop.f32.mrb[54].mxu0  ;;  %v4918_v3 = vadd.f32 %v2044_v11, %v4445_v10  ;;  %v2925_v11 = vld [vmem:[%s5278_s12 + $0x28] sm:$0xff] }
 0x868   : > { %2085 = vmax.xlane.f32.xlu0 %v4893_v58  ;;  %v2047_v2 = vpop.f32.mrb[55].mxu0  ;;  %v4937_v0 = vadd.f32 %v3695_v35, %v4445_v10 }
 0x869   : > { %v4923_v60 = vadd.f32 %v2047_v2, %v4445_v10  ;;  %v2784_v2 = vld [vmem:[%s5276_s10 + $0x40] sm:$0xff] }
 0x86c   : > { %617 = vperm.xlu1 %3908, %v547_v14  }
 0x86d   : > { %v3698_v46 = vpop.f32.mrb[56].mxu0 }
 0x86e   : > { %v2060_v33 = vpop.f32.mrb[57].mxu0  ;;  %v4910_v36 = vadd.f32 %v3698_v46, %v4445_v10 }
 0x86f   : > { %v3699_v17 = vpop.f32.mrb[58].mxu0  ;;  %v4907_v43 = vadd.f32 %v2060_v33, %v4445_v10 }
 0x870   : > { %v2063_v25 = vpop.f32.mrb[59].mxu0  ;;  %v4951_v5 = vadd.f32 %v3699_v17, %v4445_v10  ;;  %v2927_v17 = vld [vmem:[%s5278_s12 + $0x38] sm:$0xff] }
 0x871   : > { %v4941_v42 = vadd.f32 %v2063_v25, %v4445_v10  ;;  %v2779_v10 = vld [vmem:[%s5276_s10 + $0x18] sm:$0xff] }
 0x87e   : > { %612 = vperm.xlu0 %3907, %v546_v49  }
 0x890   : > { %2089 = vmax.xlane.f32.xlu1 %v4903_v24 }
 0x894   : > { %2099 = vmax.xlane.f32.xlu1 %v4907_v43 }
 0x898   : > { %2103 = vmax.xlane.f32.xlu1 %v4910_v36 }
 0x89d   : > { %2087 = vmax.xlane.f32.xlu0 %v4915_v13 }
 0x8a1   : > { %2091 = vmax.xlane.f32.xlu0 %v4918_v3 }
 0x8a5   : > { %2093 = vmax.xlane.f32.xlu0 %v4923_v60 }
 0x8a9   : > { %622 = vperm.xlu1 %3908, %v548_v57   ;;  %2095 = vmax.xlane.f32.xlu0 %v4930_v59  ;;  %v2786_v57 = vld [vmem:[%s5276_s10 + $0x50] sm:$0xff] }
 0x8ad   : > { %2283 = vperm.xlu1 %3908, %v2273_v61   ;;  %2097 = vmax.xlane.f32.xlu0 %v4937_v0 }
 0x8b1   : > { %2288 = vperm.xlu1 %3908, %v2274_v7   ;;  %2101 = vmax.xlane.f32.xlu0 %v4941_v42 }
 0x8b5   : > { %2298 = vperm.xlu1 %3908, %v2276_v20   ;;  %2105 = vmax.xlane.f32.xlu0 %v4951_v5 }
 0x8b9   : > { %2308 = vperm.xlu1 %3908, %v2278_v56  }
 0x8bd   : > { %2318 = vperm.xlu1 %3908, %v2280_v1  }
 0x8c1   : > { %2799 = vperm.xlu1 %3908, %v2777_v48   ;;  %v2790_v48 = vld [vmem:[%s5276_s10 + $0x70] sm:$0xff] }
 0x8c5   : > { %2809 = vperm.xlu1 %3908, %v2779_v10  }
 0x8c9   : > { %2819 = vperm.xlu1 %3908, %v2781_v8  }
 0x8cb   : > { %627 = vperm.xlu0 %3907, %v549_v15  }
 0x8cd   : > { %2829 = vperm.xlu1 %3908, %v2783_v41   ;;  %v2920_v41 = vld [vmem:[%s5278_s12] sm:$0xff] }
 0x8cf   : > { %2293 = vperm.xlu0 %3907, %v2275_v28  }
 0x8d1   : > { %2839 = vperm.xlu1 %3908, %v2785_v29  }
 0x8d3   : > { %2303 = vperm.xlu0 %3907, %v2277_v40  }
 0x8d5   : > { %2849 = vperm.xlu1 %3908, %v2787_v54  }
 0x8d7   : > { %2313 = vperm.xlu0 %3907, %v2279_v19  }
 0x8d9   : > { %2859 = vperm.xlu1 %3908, %v2789_v50  }
 0x8db   : > { %2794 = vperm.xlu0 %3907, %v2776_v51  }
 0x8dd   : > { %2869 = vperm.xlu1 %3908, %v2791_v63  }
 0x8df   : > { %2804 = vperm.xlu0 %3907, %v2778_v22   ;;  %v2924_v22 = vld [vmem:[%s5278_s12 + $0x20] sm:$0xff] }
 0x8e1   : > { %2935 = vperm.xlu1 %3908, %v2921_v47  }
 0x8e3   : > { %2814 = vperm.xlu0 %3907, %v2780_v27  }
 0x8e5   : > { %2945 = vperm.xlu1 %3908, %v2923_v26   ;;  %v2080_v32 = vpop.xlane.xlu0 %2079 }
 0x8e6   : > { %v2109_v7 = vsub.f32 %v4873_v21, %v2080_v32 }
 0x8e7   : > { %2824 = vperm.xlu0 %3907, %v2782_v34  }
 0x8e8   : > { %v2078_v35 = vpop.xlane.xlu1 %2077  ;;  %v2127_v1 = vmul.f32 1.442695, %v2109_v7 }
 0x8e9   : > { %v2108_v14 = vsub.f32 %v4877_v52, %v2078_v35  ;;  %2955 = vperm.xlu1 %3908, %v2925_v11   ;;  %v2076_v46 = vpop.xlane.xlu0 %2075 }
 0x8ea   : > { %v2107_v33 = vsub.f32 %v4880_v53, %v2076_v46  ;;  %v2788_v53 = vld [vmem:[%s5276_s10 + $0x60] sm:$0xff] }
 0x8eb   : > { %v2125_v25 = vmul.f32 1.442695, %v2108_v14  ;;  %2834 = vperm.xlu0 %3907, %v2784_v2  }
 0x8ec   : > { %v2123_v49 = vmul.f32 1.442695, %v2107_v33  ;;  %v618_v40 = vpop.permute.xlu1 %617 }
 0x8ed   : > { %4045 = vpow2.f32 %v2125_v25  ;;  %2965 = vperm.xlu1 %3908, %v2927_v17   ;;  %v2082_v61 = vpop.xlane.xlu0 %2081  ;;  %v781_v19 = vadd.f32 %v4616_v39, %v618_v40  ;;  %v2926_v39 = vld [vmem:[%s5278_s12 + $0x30] sm:$0xff] }
 0x8ee   : > { %4047 = vpow2.f32 %v2123_v49  ;;  %v2110_v52 = vsub.f32 %v4885_v55, %v2082_v61 }
 0x8ef   : > { %2844 = vperm.xlu0 %3907, %v2786_v57  }
 0x8f0   : > { %v2129_v20 = vmul.f32 1.442695, %v2110_v52 }
 0x8f1   : > { %v2084_v56 = vpop.xlane.xlu0 %2083 }
 0x8f2   : > { %4049 = vpow2.f32 %v2129_v20  ;;  %v2111_v21 = vsub.f32 %v4888_v31, %v2084_v56 }
 0x8f3   : > { %2854 = vperm.xlu0 %3907, %v2788_v53   ;;  %4051 = vpow2.f32 %v2127_v1 }
 0x8f4   : > { %v2131_v54 = vmul.f32 1.442695, %v2111_v21 }
 0x8f5   : > { %v2086_v10 = vpop.xlane.xlu0 %2085 }
 0x8f6   : > { %v2112_v8 = vsub.f32 %v4893_v58, %v2086_v10  ;;  %v2922_v58 = vld [vmem:[%s5278_s12 + $0x10] sm:$0xff] }
 0x8f7   : > { %v4046_v55 = vpop.eup %4045  ;;  %2864 = vperm.xlu0 %3907, %v2790_v48  }
 0x8f8   : > { %v4048_v15 = vpop.eup %4047  ;;  %v2133_v28 = vmul.f32 1.442695, %v2112_v8 }
 0x8f9   : > { %v2155_v29 = vpack.c.bf16 %v4046_v55, %v4048_v15 }
 0x8fa   : > { %4053 = vpow2.f32 %v2133_v28 }
 0x8fb   : > { %2930 = vperm.xlu0 %3907, %v2920_v41   ;;  %3721 = vmatpush3.bf16.xpose.msra.mxu0 %v2155_v29  ;;  %4055 = vpow2.f32 %v2131_v54 }
 0x8fc   : > { %3722 = vmatprep.subr.bf16.mxu0 %v4186_v44  ;;  %v4050_v51 = vpop.eup %4049 }
 0x8fd   : > { %v613_v31 = vpop.permute.xlu0 %612  ;;  %v4052_v47 = vpop.eup %4051 }
 0x8fe   : > { %v778_v50 = vadd.f32 %v4612_v38, %v613_v31  ;;  %v2156_v27 = vpack.c.bf16 %v4050_v51, %v4052_v47 }
 0x8ff   : > { %2940 = vperm.xlu0 %3907, %v2922_v58  }
 0x900   : > { %v798_v63 = vpack.c.bf16 %v781_v19, %v778_v50 }
 0x902   : > { %3679 = vmatmul.mubr.bf16.vlgmr.msra.gmra.mrb[48].mxu1 %v798_v63 }
 0x903   : > { %3701 = vmatpush3.bf16.xpose.msra.mxu1 %v2155_v29  ;;  %2950 = vperm.xlu0 %3907, %v2924_v22  }
 0x904   : > { %3723 = vmatpush3.bf16.xpose.msra.mxu0 %v2156_v27  ;;  %3702 = vmatprep.subr.bf16.mxu1 %v4186_v44  ;;  %v4054_v38 = vpop.eup %4053 }
 0x905   : > { %3724 = vmatprep.subr.bf16.mxu0 %v4186_v44  ;;  %3716 = vmatprep.mubr.msk.bf16.mxu1 %vm4187_vm3, %v4186_v44  ;;  %v4056_v26 = vpop.eup %4055 }
 0x906   : > { %v2157_v34 = vpack.c.bf16 %v4054_v38, %v4056_v26 }
 0x907   : > { %2960 = vperm.xlu0 %3907, %v2926_v39  }
 0x90b   : > { %3703 = vmatpush3.bf16.xpose.msra.mxu1 %v2156_v27 }
 0x90c   : > { %3725 = vmatpush3.bf16.xpose.msra.mxu0 %v2157_v34  ;;  %3704 = vmatprep.subr.bf16.mxu1 %v4186_v44 }
 0x90d   : > { %3726 = vmatprep.subr.bf16.mxu0 %v4186_v44 }
 0x913   : > { %3705 = vmatpush3.bf16.xpose.msra.mxu1 %v2157_v34 }
 0x914   : > { %3706 = vmatprep.subr.bf16.mxu1 %v4186_v44 }
 0x91d   : > { %v2090_v32 = vpop.xlane.xlu1 %2089 }
 0x91e   : > { %v2114_v11 = vsub.f32 %v4903_v24, %v2090_v32 }
 0x920   : > { %v2137_v35 = vmul.f32 1.442695, %v2114_v11 }
 0x921   : > { %v2100_v48 = vpop.xlane.xlu1 %2099 }
 0x922   : > { %4057 = vpow2.f32 %v2137_v35  ;;  %v2119_v10 = vsub.f32 %v4907_v43, %v2100_v48 }
 0x924   : > { %v2147_v28 = vmul.f32 1.442695, %v2119_v10 }
 0x925   : > { %v2104_v15 = vpop.xlane.xlu1 %2103 }
 0x926   : > { %v2121_v43 = vsub.f32 %v4910_v36, %v2104_v15 }
 0x928   : > { %v2151_v50 = vmul.f32 1.442695, %v2121_v43 }
 0x929   : > { %v623_v40 = vpop.permute.xlu1 %622 }
 0x92a   : > { %v2088_v2 = vpop.xlane.xlu0 %2087  ;;  %v786_v51 = vadd.f32 %v4610_v37, %v623_v40 }
 0x92b   : > { %v2113_v14 = vsub.f32 %v4915_v13, %v2088_v2 }
 0x92c   : > { %v4058_v7 = vpop.eup %4057 }
 0x92d   : > { %v2135_v46 = vmul.f32 1.442695, %v2113_v14 }
 0x92e   : > { %v2092_v33 = vpop.xlane.xlu0 %2091 }
 0x92f   : > { %4059 = vpow2.f32 %v2135_v46  ;;  %v2115_v17 = vsub.f32 %v4918_v3, %v2092_v33 }
 0x931   : > { %v2139_v25 = vmul.f32 1.442695, %v2115_v17 }
 0x932   : > { %v2094_v49 = vpop.xlane.xlu0 %2093 }
 0x933   : > { %v2116_v57 = vsub.f32 %v4923_v60, %v2094_v49  ;;  %4061 = vpow2.f32 %v2139_v25 }
 0x935   : > { %v2141_v61 = vmul.f32 1.442695, %v2116_v57 }
 0x936   : > { %v2096_v52 = vpop.xlane.xlu0 %2095 }
 0x937   : > { %4063 = vpow2.f32 %v2141_v61  ;;  %v2117_v24 = vsub.f32 %v4930_v59, %v2096_v52 }
 0x939   : > { %v4060_v53 = vpop.eup %4059  ;;  %v2143_v20 = vmul.f32 1.442695, %v2117_v24 }
 0x93a   : > { %v2098_v13 = vpop.xlane.xlu0 %2097  ;;  %v2158_v56 = vpack.c.bf16 %v4058_v7, %v4060_v53  ;;  %v3922_v7 = vld [vmem:[%s5272_s6 + $0x8] sm:$0xff]   ;;  %v3923_v53 = vld [vmem:[%s5272_s6 + $0x10] sm:$0xff]  }
 0x93b   : > { %v2118_v1 = vsub.f32 %v4937_v0, %v2098_v13  ;;  %4065 = vpow2.f32 %v2143_v20  ;;  %v3925_v20 = vld [vmem:[%s5275_s9] sm:$0xff]   ;;  %v2284_v13 = vpop.permute.xlu1 %2283 }
 0x93c   : > { %3707 = vmatpush3.bf16.xpose.msra.mxu1 %v2158_v56  ;;  %3727 = vmatpush3.bf16.xpose.msra.mxu0 %v2158_v56 }
 0x93d   : > { %v2145_v3 = vmul.f32 1.442695, %v2118_v1  ;;  %3708 = vmatprep.subr.bf16.mxu1 %v4186_v44  ;;  %3728 = vmatprep.subr.bf16.mxu0 %v4186_v44  ;;  %v4062_v8 = vpop.eup %4061 }
 0x93e   : > { %v2102_v60 = vpop.xlane.xlu0 %2101 }
 0x93f   : > { %4067 = vpow2.f32 %v2145_v3  ;;  %v2120_v59 = vsub.f32 %v4941_v42, %v2102_v60  ;;  %v2289_v56 = vpop.permute.xlu1 %2288 }
 0x941   : > { %v4064_v55 = vpop.eup %4063  ;;  %v2149_v21 = vmul.f32 1.442695, %v2120_v59 }
 0x942   : > { %v2106_v0 = vpop.xlane.xlu0 %2105  ;;  %v2159_v41 = vpack.c.bf16 %v4064_v55, %v4062_v8 }
 0x943   : > { %4069 = vpow2.f32 %v2149_v21  ;;  %v2122_v29 = vsub.f32 %v4951_v5, %v2106_v0  ;;  %v2299_v1 = vpop.permute.xlu1 %2298 }
 0x944   : > { %3709 = vmatpush3.bf16.xpose.msra.mxu1 %v2159_v41  ;;  %3729 = vmatpush3.bf16.xpose.msra.mxu0 %v2159_v41  ;;  %4071 = vpow2.f32 %v2147_v28 }
 0x945   : > { %3710 = vmatprep.subr.bf16.mxu1 %v4186_v44  ;;  %3730 = vmatprep.subr.bf16.mxu0 %v4186_v44  ;;  %v4066_v42 = vpop.eup %4065  ;;  %v2153_v58 = vmul.f32 1.442695, %v2122_v29 }
 0x947   : > { %4073 = vpow2.f32 %v2153_v58  ;;  %v2309_v59 = vpop.permute.xlu1 %2308 }
 0x948   : > { %4075 = vpow2.f32 %v2151_v50 }
 0x949   : > { %v4068_v54 = vpop.eup %4067  ;;  %4077 = vrcp.f32 %v4868_v4 }
 0x94a   : > { %v628_v31 = vpop.permute.xlu0 %627  ;;  %v2160_v19 = vpack.c.bf16 %v4068_v54, %v4066_v42 }
 0x94b   : > { %v789_v63 = vadd.f32 %v4614_v18, %v628_v31  ;;  %v2319_v42 = vpop.permute.xlu1 %2318 }
 0x94c   : > { %3711 = vmatpush3.bf16.xpose.msra.mxu1 %v2160_v19  ;;  %3731 = vmatpush3.bf16.xpose.msra.mxu0 %v2160_v19 }
 0x94d   : > { %v799_v5 = vpack.c.bf16 %v789_v63, %v786_v51  ;;  %3712 = vmatprep.subr.bf16.mxu1 %v4186_v44  ;;  %3732 = vmatprep.subr.bf16.mxu0 %v4186_v44  ;;  %v4070_v36 = vpop.eup %4069 }
 0x94e   : > { %v4072_v22 = vpop.eup %4071  ;;  %v2294_v48 = vpop.permute.xlu0 %2293 }
 0x94f   : > { %v2161_v47 = vpack.c.bf16 %v4070_v36, %v4072_v22  ;;  %v3926_v22 = vld [vmem:[%s5275_s9 + $0x8] sm:$0xff]  }
 0x951   : > { %v4074_v37 = vpop.eup %4073 }
 0x952   : > { %v4076_v18 = vpop.eup %4075  ;;  %v2304_v15 = vpop.permute.xlu0 %2303 }
 0x953   : > { %v2162_v27 = vpack.c.bf16 %v4074_v37, %v4076_v18  ;;  %v4078_v39 = vpop.eup %4077  ;;  %v3928_v37 = vld [vmem:[%s5275_s9 + $0x18] sm:$0xff]   ;;  %v3929_v18 = vld [vmem:[%s5275_s9 + $0x20] sm:$0xff]  }
 0x954   : > { %3713 = vmatpush3.bf16.xpose.msra.mxu1 %v2161_v47  ;;  %3733 = vmatpush3.bf16.xpose.msra.mxu0 %v2161_v47  ;;  %v1931_v38 = vrot.slane %v4078_v39, %v4619_v62  ;;  %v3927_v47 = vld [vmem:[%s5275_s9 + $0x10] sm:$0xff]   ;;  %v3936_v39 = vld [vmem:[%s5274_s8 + $0x18] sm:$0xff]  }
 0x955   : > { %3714 = vmatprep.subr.bf16.mxu1 %v4186_v44  ;;  %3734 = vmatprep.subr.bf16.mxu0 %v4186_v44  ;;  %v3921_v44 = vld [vmem:[%s5272_s6] sm:$0xff]  }
 0x956   : > { %v2314_v54 = vpop.permute.xlu0 %2313 }
 0x95c   : > { %3715 = vmatpush3.bf16.xpose.msra.mxu1 %v2162_v27  ;;  %3735 = vmatpush3.bf16.xpose.msra.mxu0 %v2162_v27  ;;  %v3933_v27 = vld [vmem:[%s5274_s8] sm:$0xff]  }
 0x95d   : > { %3740 = vmatprep.subr.bf16.mxu1 %v4622_v6 }
 0x963   : > { %3717 = vmatmul.mubr.bf16.vlgmr.msra.gmra.mrb[52].mxu1 %v4188_v45  ;;  %3737 = vmatmul.mubr.bf16.vlgmr.msra.gmra.mrb[60].mxu0 %v799_v5 }
 0x964   : > { %3741 = vmatpush3.bf16.msra.mxu1 %v4622_v6  ;;  %3748 = vmatprep.mubr.msk.bf16.mxu1 %vm670_vm0, %v3921_v44  ;;  %v3935_v44 = vld [vmem:[%s5274_s8 + $0x10] sm:$0xff]  }
 0x965   : > { %3742 = vmatprep.subr.bf16.mxu1 %v4870_v30  ;;  %3764 = vmatprep.mubr.msk.bf16.mxu0 %vm670_vm0, %v3925_v20 }
 0x968   : > { %3743 = vmatpush3.bf16.msra.mxu1 %v4870_v30 }
 0x9d5   : > { %v1920_v26 = vpop.f32.mrb[48].mxu1 }
 0x9d6   : > { %v1932_v45 = vmul.f32 %v1931_v38, %v1920_v26  ;;  %v3680_v34 = vpop.f32.mrb[49].mxu1  ;;  %v3938_v26 = vld [vmem:[%s5274_s8 + $0x28] sm:$0xff]  }
 0x9d7   : > { %v1923_v32 = vpop.f32.mrb[50].mxu1  ;;  %v3940_v34 = vld [vmem:[%s5274_s8 + $0x38] sm:$0xff]  }
 0x9d8   : > { %v1933_v6 = vmul.f32 %v1931_v38, %v1923_v32  ;;  %v3681_v11 = vpop.f32.mrb[51].mxu1  ;;  %v3937_v38 = vld [vmem:[%s5274_s8 + $0x20] sm:$0xff]  }
 0x9d9   : > { %v3941_v32 = vld [vmem:[%s5277_s11] sm:$0xff]   ;;  %v2800_v11 = vpop.permute.xlu1 %2799 }
 0x9da   : > { %v2263_v35 = vpack.c.bf16 %v1933_v6, %v1932_v45  ;;  %v3939_v45 = vld [vmem:[%s5274_s8 + $0x30] sm:$0xff]   ;;  %v2795_v6 = vpop.permute.xlu0 %2794 }
 0x9dc   : > { %3744 = vmatprep.subr.bf16.mxu1 %v2263_v35 }
 0x9dd   : > { %3745 = vmatpush3.bf16.msra.mxu1 %v2263_v35 }
 0x9de   : > { %v2805_v35 = vpop.permute.xlu0 %2804 }
 0xa36   : > { %v2197_v30 = vpop.f32.mrb[52].mxu1  ;;  %v2237_v4 = vpop.f32.mrb[60].mxu0 }
 0xa37   : > { %4079 = vrcp.f32 %v2197_v30  ;;  %v3718_v2 = vpop.f32.mrb[53].mxu1  ;;  %v3738_v14 = vpop.f32.mrb[61].mxu0 }
 0xa38   : > { %v2200_v46 = vpop.f32.mrb[54].mxu1  ;;  %v2240_v33 = vpop.f32.mrb[62].mxu0 }
 0xa39   : > { %v3719_v17 = vpop.f32.mrb[55].mxu1  ;;  %v3739_v25 = vpop.f32.mrb[63].mxu0 }
 0xa3a   : > { %v2810_v30 = vpop.permute.xlu1 %2809 }
 0xa3e   : > { %v2820_v2 = vpop.permute.xlu1 %2819 }
 0xa41   : > { %v4080_v49 = vpop.eup %4079 }
 0xa42   : > { %v2248_v57 = vrot.slane %v4080_v49, %v4619_v62  ;;  %v3924_v62 = vld [vmem:[%s5272_s6 + $0x18] sm:$0xff]   ;;  %v2830_v25 = vpop.permute.xlu1 %2829 }
 0xa44   : > { %v2249_v61 = vmul.f32 %v2248_v57, %v2237_v4  ;;  %v2250_v52 = vmul.f32 %v2248_v57, %v2240_v33  ;;  %v2815_v4 = vpop.permute.xlu0 %2814 }
 0xa46   : > { %v2264_v24 = vpack.c.bf16 %v2250_v52, %v2249_v61 }
 0xa48   : > { %3746 = vmatprep.subr.bf16.mxu1 %v2264_v24  ;;  %v2825_v14 = vpop.permute.xlu0 %2824 }
 0xa49   : > { %3747 = vmatpush3.bf16.msra.mxu1 %v2264_v24 }
 0xa4c   : > { %3749 = vmatmul.mubr.msk.bf16.vlgmr.msra.gmra.mrb[56].mxu1 %vm670_vm0, %v3922_v7 }
 0xa4d   : > { %3752 = vmatprep.mubr.msk.bf16.mxu1 %vm670_vm0, %v3923_v53 }
 0xa54   : > { %3753 = vmatmul.mubr.msk.bf16.gmra.mrb[60].mxu1 %vm670_vm0, %v3924_v62  ;;  %v2835_v62 = vpop.permute.xlu0 %2834 }
 0xa55   : > { %3820 = vmatprep.mubr.bf16.mxu1 %v3941_v32 }
 0xb1f   : > { %v3750_v3 = vpop.f32.mrb[56].mxu1 }
 0xb20   : > { %v2387_v60 = vpop.f32.mrb[57].mxu1  ;;  %v2396_v8 = vadd.f32 %v3750_v3, %v2294_v48 }
 0xb21   : > { %v3751_v10 = vpop.f32.mrb[58].mxu1  ;;  %v2388_v0 = vadd.f32 %v2387_v60, %v2284_v13 }
 0xb22   : > { %v2399_v55 = vadd.f32 %v3751_v10, %v2299_v1  ;;  %v2390_v21 = vpop.f32.mrb[59].mxu1  ;;  %v2840_v1 = vpop.permute.xlu1 %2839 }
 0xb23   : > { %v2391_v41 = vadd.f32 %v2390_v21, %v2289_v56 }
 0xb24   : > { %v2451_v28 = vpack.c.bf16 %v2399_v55, %v2396_v8 }
 0xb25   : > { %v2450_v29 = vpack.c.bf16 %v2391_v41, %v2388_v0 }
 0xb27   : > { %v3754_v43 = vpop.f32.mrb[60].mxu1  ;;  %3756 = vmatprep.subr.bf16.mxu0 %v2450_v29 }
 0xb28   : > { %v2403_v40 = vpop.f32.mrb[61].mxu1  ;;  %3757 = vmatpush3.bf16.msra.mxu0 %v2450_v29  ;;  %v2412_v31 = vadd.f32 %v3754_v43, %v2314_v54  ;;  %v2850_v29 = vpop.permute.xlu1 %2849 }
 0xb29   : > { %v3755_v58 = vpop.f32.mrb[62].mxu1  ;;  %3758 = vmatprep.subr.bf16.mxu0 %v2451_v28  ;;  %v2404_v51 = vadd.f32 %v2403_v40, %v2304_v15  ;;  %v2845_v15 = vpop.permute.xlu0 %2844 }
 0xb2a   : > { %v2415_v19 = vadd.f32 %v3755_v58, %v2319_v42  ;;  %v2406_v50 = vpop.f32.mrb[63].mxu1 }
 0xb2b   : > { %v2407_v63 = vadd.f32 %v2406_v50, %v2309_v59 }
 0xb2c   : > { %v2453_v5 = vpack.c.bf16 %v2415_v19, %v2412_v31  ;;  %3759 = vmatpush3.bf16.msra.mxu0 %v2451_v28 }
 0xb2d   : > { %v2452_v36 = vpack.c.bf16 %v2407_v63, %v2404_v51  ;;  %v2855_v50 = vpop.permute.xlu0 %2854 }
 0xb2f   : > { %3760 = vmatprep.subr.bf16.mxu0 %v2452_v36 }
 0xb30   : > { %3761 = vmatpush3.bf16.msra.mxu0 %v2452_v36 }
 0xb31   : > { %3762 = vmatprep.subr.bf16.mxu0 %v2453_v5 }
 0xb34   : > { %3763 = vmatpush3.bf16.msra.mxu0 %v2453_v5 }
 0xb35   : > { %3780 = vmatprep.subr.bf16.mxu0 %v4361_v9 }
 0xb37   : > { %3765 = vmatmul.mubr.msk.bf16.vlgmr.msra.gmra.mrb[64].mxu0 %vm670_vm0, %v3926_v22  ;;  %v2860_v22 = vpop.permute.xlu1 %2859 }
 0xb38   : > { %3781 = vmatpush3.bf16.msra.mxu0 %v4361_v9  ;;  %3768 = vmatprep.mubr.msk.bf16.mxu0 %vm670_vm0, %v3927_v47  ;;  %v3930_v9 = vld [vmem:[%s5275_s9 + $0x28] sm:$0xff]  }
 0xb39   : > { %3782 = vmatprep.subr.bf16.mxu0 %v4367_v12 }
 0xb3c   : > { %3783 = vmatpush3.bf16.msra.mxu0 %v4367_v12  ;;  %v3931_v12 = vld [vmem:[%s5275_s9 + $0x30] sm:$0xff]  }
 0xb3d   : > { %3784 = vmatprep.subr.bf16.mxu0 %v4375_v16 }
 0xb3f   : > { %3769 = vmatmul.mubr.msk.bf16.gmra.mrb[68].mxu0 %vm670_vm0, %v3928_v37 }
 0xb40   : > { %3772 = vmatprep.mubr.msk.bf16.mxu0 %vm670_vm0, %v3929_v18  ;;  %3785 = vmatpush3.bf16.msra.mxu0 %v4375_v16  ;;  %v3932_v16 = vld [vmem:[%s5275_s9 + $0x38] sm:$0xff]  }
 0xb41   : > { %3786 = vmatprep.subr.bf16.mxu0 %v4383_v23 }
 0xb44   : > { %3787 = vmatpush3.bf16.msra.mxu0 %v4383_v23  ;;  %v3934_v23 = vld [vmem:[%s5274_s8 + $0x8] sm:$0xff]  }
 0xb47   : > { %3773 = vmatmul.mubr.msk.bf16.gmra.mrb[72].mxu0 %vm670_vm0, %v3930_v9 }
 0xb48   : > { %3776 = vmatprep.mubr.msk.bf16.mxu0 %vm670_vm0, %v3931_v12 }
 0xb4f   : > { %3777 = vmatmul.mubr.msk.bf16.gmra.mrb[76].mxu0 %vm670_vm0, %v3932_v16 }
 0xb50   : > { %3788 = vmatprep.mubr.msk.bf16.mxu0 %vm670_vm0, %v3933_v27  ;;  %v2865_v27 = vpop.permute.xlu0 %2864 }
 0xb57   : > { %3789 = vmatmul.mubr.msk.bf16.vlgmr.msra.gmra.mrb[64].mxu0 %vm670_vm0, %v3934_v23 }
 0xb58   : > { %3792 = vmatprep.mubr.msk.bf16.mxu0 %vm670_vm0, %v3935_v44 }
 0xb5f   : > { %3793 = vmatmul.mubr.msk.bf16.gmra.mrb[68].mxu0 %vm670_vm0, %v3936_v39 }
 0xb60   : > { %3796 = vmatprep.mubr.msk.bf16.mxu0 %vm670_vm0, %v3937_v38 }
 0xb67   : > { %3797 = vmatmul.mubr.msk.bf16.gmra.mrb[72].mxu0 %vm670_vm0, %v3938_v26  ;;  %v2870_v26 = vpop.permute.xlu1 %2869 }
 0xb68   : > { %3800 = vmatprep.mubr.msk.bf16.mxu0 %vm670_vm0, %v3939_v45 }
 0xb6f   : > { %3801 = vmatmul.mubr.msk.bf16.gmra.mrb[76].mxu0 %vm670_vm0, %v3940_v34 }
 0xc2a   : > { %v3790_v46 = vpop.f32.mrb[64].mxu0 }
 0xc2b   : > { %v2874_v33 = vadd.f32 %v3790_v46, %v2805_v35  ;;  %v2713_v17 = vpop.f32.mrb[65].mxu0 }
 0xc2c   : > { %v2872_v49 = vadd.f32 %v2795_v6, %v2713_v17  ;;  %v3791_v57 = vpop.f32.mrb[66].mxu0  ;;  %v3943_v17 = vld [vmem:[%s5277_s11 + $0x10] sm:$0xff]  }
 0xc2d   : > { %v2875_v61 = vadd.f32 %v3791_v57, %v2810_v30  ;;  %v2716_v52 = vpop.f32.mrb[67].mxu0  ;;  %v2890_v7 = vmax.f32 %v2874_v33, 0.0  ;;  %v3942_v33 = vld [vmem:[%s5277_s11 + $0x8] sm:$0xff]   ;;  %v2936_v57 = vpop.permute.xlu1 %2935 }
 0xc2e   : > { %v2873_v24 = vadd.f32 %v2800_v11, %v2716_v52  ;;  %v2888_v20 = vmax.f32 %v2872_v49, 0.0  ;;  %v2931_v49 = vpop.permute.xlu0 %2930 }
 0xc2f   : > { %v2891_v53 = vmax.f32 %v2875_v61, 0.0 }
 0xc30   : > { %v2889_v13 = vmax.f32 %v2873_v24, 0.0 }
 0xc31   : > { %v2905_v56 = vpack.c.bf16 %v2891_v53, %v2890_v7  ;;  %v2946_v52 = vpop.permute.xlu1 %2945 }
 0xc32   : > { %v2904_v48 = vpack.c.bf16 %v2889_v13, %v2888_v20  ;;  %v3794_v3 = vpop.f32.mrb[68].mxu0  ;;  %v2941_v61 = vpop.permute.xlu0 %2940 }
 0xc33   : > { %v2878_v60 = vadd.f32 %v3794_v3, %v2825_v14  ;;  %v2729_v10 = vpop.f32.mrb[69].mxu0 }
 0xc34   : > { %v2876_v59 = vadd.f32 %v2815_v4, %v2729_v10  ;;  %v3795_v8 = vpop.f32.mrb[70].mxu0  ;;  %3804 = vmatprep.subr.bf16.mxu1 %v2904_v48  ;;  %v4082_v10 = vld [vmem:[%s4349_s23] sm:$0xff] }
 0xc35   : > { %v2879_v55 = vadd.f32 %v3795_v8, %v2830_v25  ;;  %v2732_v21 = vpop.f32.mrb[71].mxu0  ;;  %3805 = vmatpush3.bf16.msra.mxu1 %v2904_v48  ;;  %v2894_v41 = vmax.f32 %v2878_v60, 0.0  ;;  %v3944_v25 = vld [vmem:[%s5277_s11 + $0x18] sm:$0xff]   ;;  %v2956_v60 = vpop.permute.xlu1 %2955 }
 0xc36   : > { %v2877_v0 = vadd.f32 %v2820_v2, %v2732_v21  ;;  %3806 = vmatprep.subr.bf16.mxu1 %v2905_v56  ;;  %v2892_v43 = vmax.f32 %v2876_v59, 0.0 }
 0xc37   : > { %v2895_v28 = vmax.f32 %v2879_v55, 0.0  ;;  %v4083_v55 = vld [vmem:[%s4349_s23 + $0x18] sm:$0xff] }
 0xc38   : > { %v2893_v42 = vmax.f32 %v2877_v0, 0.0 }
 0xc39   : > { %v2907_v40 = vpack.c.bf16 %v2895_v28, %v2894_v41  ;;  %3807 = vmatpush3.bf16.msra.mxu1 %v2905_v56  ;;  %v4081_v56 = vld [vmem:[%s4349_s23 + $0x10] sm:$0xff] }
 0xc3a   : > { %v2906_v54 = vpack.c.bf16 %v2893_v42, %v2892_v43  ;;  %v3798_v58 = vpop.f32.mrb[72].mxu0  ;;  %v2966_v42 = vpop.permute.xlu1 %2965 }
 0xc3b   : > { %v2882_v31 = vadd.f32 %v3798_v58, %v2845_v15  ;;  %v2745_v19 = vpop.f32.mrb[73].mxu0  ;;  %v4084_v15 = vld [vmem:[%s4349_s23 + $0x8] sm:$0xff]  ;;  %v4085_v58 = vld [vmem:[%s4349_s23 + $0x30] sm:$0xff] }
 0xc3c   : > { %v2880_v51 = vadd.f32 %v2835_v62, %v2745_v19  ;;  %v3799_v63 = vpop.f32.mrb[74].mxu0  ;;  %3808 = vmatprep.subr.bf16.mxu1 %v2906_v54  ;;  %v2951_v62 = vpop.permute.xlu0 %2950 }
 0xc3d   : > { %v2883_v5 = vadd.f32 %v3799_v63, %v2850_v29  ;;  %v2748_v36 = vpop.f32.mrb[75].mxu0  ;;  %3809 = vmatpush3.bf16.msra.mxu1 %v2906_v54  ;;  %v2898_v37 = vmax.f32 %v2882_v31, 0.0 }
 0xc3e   : > { %v2881_v47 = vadd.f32 %v2840_v1, %v2748_v36  ;;  %3810 = vmatprep.subr.bf16.mxu1 %v2907_v40  ;;  %v2896_v9 = vmax.f32 %v2880_v51, 0.0  ;;  %v4086_v51 = vld [vmem:[%s4349_s23 + $0x20] sm:$0xff]  ;;  %v4087_v36 = vld [vmem:[%s4349_s23 + $0x38] sm:$0xff] }
 0xc3f   : > { %v2899_v18 = vmax.f32 %v2883_v5, 0.0 }
 0xc40   : > { %v2897_v12 = vmax.f32 %v2881_v47, 0.0  ;;  %v2961_v41 = vpop.permute.xlu0 %2960  ;;  %v4088_v47 = vld [vmem:[%s4349_s23 + $0x28] sm:$0xff] }
 0xc41   : > { %v2909_v16 = vpack.c.bf16 %v2899_v18, %v2898_v37  ;;  %3811 = vmatpush3.bf16.msra.mxu1 %v2907_v40 }
 0xc42   : > { %v2908_v23 = vpack.c.bf16 %v2897_v12, %v2896_v9  ;;  %v3802_v44 = vpop.f32.mrb[76].mxu0 }
 0xc43   : > { %v2886_v39 = vadd.f32 %v3802_v44, %v2865_v27  ;;  %v2761_v38 = vpop.f32.mrb[77].mxu0 }
 0xc44   : > { %v2884_v45 = vadd.f32 %v2855_v50, %v2761_v38  ;;  %v3803_v34 = vpop.f32.mrb[78].mxu0  ;;  %3812 = vmatprep.subr.bf16.mxu1 %v2908_v23 }
 0xc45   : > { %v2887_v32 = vadd.f32 %v3803_v34, %v2870_v26  ;;  %v2764_v6 = vpop.f32.mrb[79].mxu0  ;;  %3813 = vmatpush3.bf16.msra.mxu1 %v2908_v23  ;;  %v2902_v35 = vmax.f32 %v2886_v39, 0.0 }
 0xc46   : > { %v2885_v11 = vadd.f32 %v2860_v22, %v2764_v6  ;;  %3814 = vmatprep.subr.bf16.mxu1 %v2909_v16  ;;  %v2900_v4 = vmax.f32 %v2884_v45, 0.0 }
 0xc47   : > { %v2903_v30 = vmax.f32 %v2887_v32, 0.0 }
 0xc48   : > { %v2901_v2 = vmax.f32 %v2885_v11, 0.0 }
 0xc49   : > { %v2911_v14 = vpack.c.bf16 %v2903_v30, %v2902_v35  ;;  %3815 = vmatpush3.bf16.msra.mxu1 %v2909_v16 }
 0xc4a   : > { %v2910_v46 = vpack.c.bf16 %v2901_v2, %v2900_v4 }
 0xc4c   : > { %3816 = vmatprep.subr.bf16.mxu1 %v2910_v46 }
 0xc4d   : > { %3817 = vmatpush3.bf16.msra.mxu1 %v2910_v46 }
 0xc4e   : > { %3818 = vmatprep.subr.bf16.mxu1 %v2911_v14 }
 0xc51   : > { %3819 = vmatpush3.bf16.msra.mxu1 %v2911_v14 }
 0xc54   : > { %3821 = vmatmul.mubr.bf16.vlgmr.msra.gmra.mrb[64].mxu1 %v3942_v33 }
 0xc55   : > { %3824 = vmatprep.mubr.bf16.mxu1 %v3943_v17 }
 0xc5c   : > { %3825 = vmatmul.mubr.bf16.gmra.mrb[68].mxu1 %v3944_v25 }
 0xd27   : > { %v3822_v24 = vpop.f32.mrb[64].mxu1 }
 0xd28   : > { %v3035_v7 = vadd.f32 %v3822_v24, %v2941_v61  ;;  %v3026_v53 = vpop.f32.mrb[65].mxu1 }
 0xd29   : > { %v3027_v20 = vadd.f32 %v3026_v53, %v2931_v49  ;;  %v3823_v13 = vpop.f32.mrb[66].mxu1 }
 0xd2a   : > { %v3059_v1 = vadd.f32 %v4081_v56, %v3035_v7  ;;  %v3038_v48 = vadd.f32 %v3823_v13, %v2946_v52  ;;  %v3029_v3 = vpop.f32.mrb[67].mxu1 }
 0xd2b   : > { %v3057_v59 = vadd.f32 %v4082_v10, %v3027_v20  ;;  %v3030_v8 = vadd.f32 %v3029_v3, %v2936_v57 }
 0xd2c   : > { %3067 = vst [vmem:[%s5193_s19 + $0x10] sm:$0xff] %v3059_v1  ;;  %v3060_v21 = vadd.f32 %v4083_v55, %v3038_v48 }
 0xd2d   : > { %3065 = vst [vmem:[%s5193_s19] sm:$0xff] %v3057_v59  ;;  %v3058_v0 = vadd.f32 %v4084_v15, %v3030_v8 }
 0xd2e   : > { %3068 = vst [vmem:[%s5193_s19 + $0x18] sm:$0xff] %v3060_v21 }
 0xd2f   : > { %3066 = vst [vmem:[%s5193_s19 + $0x8] sm:$0xff] %v3058_v0  ;;  %v3826_v28 = vpop.f32.mrb[68].mxu1 }
 0xd30   : > { %v3051_v29 = vadd.f32 %v3826_v28, %v2961_v41  ;;  %v3042_v43 = vpop.f32.mrb[69].mxu1 }
 0xd31   : > { %v3043_v40 = vadd.f32 %v3042_v43, %v2951_v62  ;;  %v3827_v54 = vpop.f32.mrb[70].mxu1 }
 0xd32   : > { %v3063_v31 = vadd.f32 %v4085_v58, %v3051_v29  ;;  %v3054_v19 = vadd.f32 %v3827_v54, %v2966_v42  ;;  %v3045_v50 = vpop.f32.mrb[71].mxu1 }
 0xd33   : > { %v3061_v63 = vadd.f32 %v4086_v51, %v3043_v40  ;;  %v3046_v5 = vadd.f32 %v3045_v50, %v2956_v60 }
 0xd34   : > { %3071 = vst [vmem:[%s5193_s19 + $0x30] sm:$0xff] %v3063_v31  ;;  %v3064_v22 = vadd.f32 %v4087_v36, %v3054_v19 }
 0xd35   : > { %3069 = vst [vmem:[%s5193_s19 + $0x20] sm:$0xff] %v3061_v63  ;;  %v3062_v37 = vadd.f32 %v4088_v47, %v3046_v5 }
 0xd36   : > { %3072 = vst [vmem:[%s5193_s19 + $0x38] sm:$0xff] %v3064_v22 }
 0xd37   : > { %3070 = vst [vmem:[%s5193_s19 + $0x28] sm:$0xff] %v3062_v37 }
 0xd38   : > { %4114 = shalt.err (!%p4111_p11)
}
 0xd39   : > { %s4115_s23 = scalar_lea.hbm %s5210_s29, 1024  ;;  %s4119_s24 = scalar_lea.hbm %s5281_s15, 4096 }
 0xd3a   : > { %p4116_p12 = scmp.ne.s32.totalorder %s5210_s29, %s4115_s23  ;;  %p4120_p2 = scmp.lt.u32.totalorder %s5210_s29, %s5281_s15 }
 0xd3b   : > { %p4121_p3 = scmp.lt.u32.totalorder %s4119_s24, %s4115_s23  ;;  %p4123_p5 = scmp.lt.u32.totalorder %s4115_s23, %s5210_s29 }
 0xd3c   : > { %p4117_p0 = pnand %p4116_p12, %p4318_p9 }
 0xd3d   : > { %p4122_p4 = por %p4121_p3, %p4120_p2 }
 0xd3e   : > { %p4118_p1 = pneg %p4117_p0 }
 0xd3f   : > { %p4124_p6 = por %p4123_p5, %p4122_p4 }
 0xd41   : > { %p4125_p7 = pnand %p4124_p6, %p4118_p1 }
 0xd43   : > { %4128 = shalt.err (!%p4125_p7)
}
 0xd44   : > { %s4190_s1 = smov 128   ;;  %s4191_s27 = smov 8  }
 0xd45   : > { %3844 = dma.vmem_to_hbm [thread:$0]  (%p4318_p9), %s5212_s17, 1024, %s5210_s29, %s5220_s26, %s4190_s1, %s4190_s1, %s4191_s27  }
 0xd46 PF: > { %p3850_p8 = scmp.ge.s32.totalorder %s4181_s28, 2  ;;  %s3103_s30 = sand.u32 1, %s4161_s0  }
 0xd47   : > { %s3104_s23 = scalar_lea.sflag [#allocation8], %s3103_s30 }
 0xd48   : > { %p3847_p10 = pnand %p3850_p8, %p4325_p13 }
 0xd4a   : > { %4156 = dma.done.wait (!%p3847_p10), %s3104_s23, 1024  }
 0xd4b   : > { %4158 = vsyncadd (!%p3847_p10), %s3104_s23, 4294966272  ;;  %s35_s28 = sadd.s32 1, %s4181_s28   ;;  %s5294_s21 = sld [smem:[#allocation11_spill]] }
 0xd4c   : > { %p32_p11 = scmp.ge.s32.totalorder %s35_s28, 6   ;;  %s5295_s1 = sld [smem:[#allocation15_spill]] }
 0xd4d   : > { %s5296_s26 = sld [smem:[#allocation12_spill]]  ;;  %s5297_s27 = sld [smem:[#allocation13_spill]] }
 0xd4e   : > { %s5298_s0 = smov %s4165_s25  ;;  %34 = sbr.rel (!%p32_p11) target bundleno = 19 (0x13), region = 114 }
 0xd51   : > { %s5299_s25 = smov %s5294_s21 }
 0xd55   :  { %3109 = vsyncpa [#allocation8], 1 }
 0xd56   :  { %3111 = vsyncpa [#allocation8 + $0x1], 1 }

</bundles_post_ra>
